<compile_context>
chip_gen: v7x
topology: tpu7x:2x2x1
jax: 0.10.0
libtpu: 0.0.40
codegen_flags: <defaults>
</compile_context>

<pallas_src>
import jax
import jax.numpy as jnp
from jax.experimental import pallas as pl
from jax.experimental.pallas import tpu as pltpu

_LANE = 128
_TILE_B_MAX = 1024                    # per-step batch tile ceiling
_TK_MAX = 2048                        # max input-dim chunk streamed per K step
_VMEM_BUDGET = 48 * 1024 * 1024       # conservative for v7x (64 MiB VMEM / TC)


def _cdiv(a, b):
    return -(-a // b)


def _round_up(x, m):
    return ((x + m - 1) // m) * m


def _pad2(a, rows, cols):
    return jnp.pad(a, ((0, rows - a.shape[0]), (0, cols - a.shape[1])))


def amodel_kernel(x_ref, w0_ref, b0_ref, w1_ref, b1_ref,
                  wf1_ref, bf1_ref, wf2_ref, bf2_ref, w4_ref, b4_ref,
                  o_ref, h0_acc):
    k = pl.program_id(1)
    nk = pl.num_programs(1)
    Hp = w1_ref.shape[0]

    @pl.when(k == 0)
    def _():
        h0_acc[...] = jnp.zeros_like(h0_acc)

    # level_0_adapt, streamed over the (padded) input dim; f32 accumulation.
    h0_acc[...] += jnp.dot(x_ref[...], w0_ref[...],
                           preferred_element_type=jnp.float32)

    @pl.when(k == nk - 1)
    def _():
        wd = w1_ref.dtype
        # level_0 bias + ReLU (f32 on VPU), cast once for the next MXU input.
        h0 = jnp.maximum(h0_acc[...] + b0_ref[...], 0.0).astype(wd)
        # level_1_fc + ReLU
        f1 = jnp.maximum(
            jnp.dot(h0, w1_ref[...], preferred_element_type=jnp.float32)
            + b1_ref[...], 0.0).astype(wd)
        # fused [level_2_fc | level_1_compress] over f1 (compress bias folded
        # into the output bias on the host; its columns get bias 0 here).
        r1 = jnp.dot(f1, wf1_ref[...],
                     preferred_element_type=jnp.float32) + bf1_ref[...]
        f2 = jnp.maximum(r1[:, :Hp], 0.0).astype(wd)
        s1 = r1[:, Hp:]
        # fused [level_3_fc | level_2_compress] over f2.
        r2 = jnp.dot(f2, wf2_ref[...],
                     preferred_element_type=jnp.float32) + bf2_ref[...]
        f3 = jnp.maximum(r2[:, :Hp], 0.0)
        s2 = r2[:, Hp:]
        # level_4_output over concat([f3, s1, s2]) in a single matmul.
        summary = jnp.concatenate([f3, s1, s2], axis=-1).astype(wd)
        out = jnp.dot(summary, w4_ref[...],
                      preferred_element_type=jnp.float32) + b4_ref[...]
        o_ref[...] = out.astype(o_ref.dtype)


def amodel_forward(x_nchw, params, weight_dtype=jnp.bfloat16):
    B = x_nchw.shape[0]
    x_flat = x_nchw.reshape(B, -1)          # nn.Flatten(1, 3)
    D = x_flat.shape[1]

    (w0, b0, w1, b1, w1c, b1c, w2, b2, w2c, b2c, w3, b3, w4, b4) = params
    H = w1.shape[1]       # hidden_full_layer_unit
    C = w1c.shape[1]      # hidden_compress_layer_unit
    OUT = w4.shape[1]     # output_size

    # ---- host-side algebra: split W4 by concat order (f3, s1, s2) and fold
    #      the compress-branch biases into the output bias (exact: no ReLU).
    w4f, w4s1, w4s2 = w4[:H], w4[H:H + C], w4[H + C:]
    b4_eff = b4 + b1c @ w4s1 + b2c @ w4s2

    # ---- pad all feature dims to lane multiples (exact; sliced off below)
    Hp = _round_up(H, _LANE)
    Cp = _round_up(C, _LANE)
    Op = _round_up(OUT, _LANE)

    # K tiling of the (padded) input dim so very large input_size never has to
    # hold w0 whole in VMEM.
    Dp0 = _round_up(D, _LANE)
    nk = _cdiv(Dp0, _TK_MAX)
    tk = _round_up(_cdiv(Dp0, nk), _LANE)
    Dp = tk * nk

    wd = jnp.dtype(weight_dtype)
    wd_b = wd.itemsize

    w0p = _pad2(w0, Dp, Hp).astype(wd)
    w1p = _pad2(w1, Hp, Hp).astype(wd)
    # fused weights: f1 -> [f2_pre | s1], f2 -> [f3_pre | s2]
    wf1 = jnp.concatenate([_pad2(w2, Hp, Hp), _pad2(w1c, Hp, Cp)], axis=1).astype(wd)
    wf2 = jnp.concatenate([_pad2(w3, Hp, Hp), _pad2(w2c, Hp, Cp)], axis=1).astype(wd)
    # full output weight over padded concat([f3, s1, s2])
    w4p = jnp.concatenate([_pad2(w4f, Hp, Op), _pad2(w4s1, Cp, Op),
                           _pad2(w4s2, Cp, Op)], axis=0).astype(wd)
    b0p = _pad2(b0, 1, Hp).astype(jnp.float32)
    b1p = _pad2(b1, 1, Hp).astype(jnp.float32)
    bf1 = jnp.concatenate([_pad2(b2, 1, Hp),
                           jnp.zeros((1, Cp), jnp.float32)], axis=1)
    bf2 = jnp.concatenate([_pad2(b3, 1, Hp),
                           jnp.zeros((1, Cp), jnp.float32)], axis=1)
    b4p = _pad2(b4_eff, 1, Op).astype(jnp.float32)

    pinned_arrays = (b0p, w1p, b1p, wf1, bf1, wf2, bf2, w4p, b4p)
    wbytes_pinned = sum(int(a.size) * a.dtype.itemsize for a in pinned_arrays)
    wbytes_all = wbytes_pinned + int(w0p.size) * w0p.dtype.itemsize

    # ---- VMEM estimate: pinned weights single-buffered, streamed tensors x2.
    def vmem_est(tb):
        w = wbytes_pinned + 2 * tk * Hp * wd_b                # pinned + w0 chunk
        io = 2 * tb * tk * wd_b + 2 * tb * Op * 4             # x tile + out tile
        acts = tb * Hp * 4                                     # h0 accumulator
        acts += tb * 4 * (4 * Hp + 2 * (Hp + Cp) + (Hp + 2 * Cp))  # live f32 temps
        return w + io + acts

    # ---- batch tile: big MXU tiles, >=2 grid steps when B allows (v7x 2 TCs),
    #      shrink to fit the VMEM budget.
    if B > 8:
        tile_b = min(_TILE_B_MAX, _round_up(_cdiv(B, 2), 8))
    else:
        tile_b = _round_up(max(B, 1), 8)
    while tile_b > 8 and vmem_est(tile_b) > _VMEM_BUDGET:
        tile_b = max(8, _round_up(tile_b // 2, 8))
    Bp = _round_up(B, tile_b)
    grid = (Bp // tile_b, nk)

    # x stored & DMA'd in the weight dtype (bf16 default) -> half HBM traffic.
    x_p = jnp.pad(x_flat, ((0, Bp - B), (0, Dp - D))).astype(wd)

    def pinned_spec(arr):
        # constant-index weight/bias: resident in VMEM, single-buffered.
        return pl.BlockSpec(arr.shape, lambda i, k: (0, 0),
                            pipeline_mode=pl.Buffered(1))

    in_specs = [
        pl.BlockSpec((tile_b, tk), lambda i, k: (i, k)),   # x (batch, K chunk)
        pl.BlockSpec((tk, Hp), lambda i, k: (k, 0)),       # w0 streamed along K
        pinned_spec(b0p), pinned_spec(w1p), pinned_spec(b1p),
        pinned_spec(wf1), pinned_spec(bf1),
        pinned_spec(wf2), pinned_spec(bf2),
        pinned_spec(w4p), pinned_spec(b4p),
    ]
    out_specs = pl.BlockSpec((tile_b, Op), lambda i, k: (i, 0))

    flops = 2 * Bp * (Dp * Hp + Hp * Hp + 2 * Hp * (Hp + Cp) + (Hp + 2 * Cp) * Op)
    bytes_accessed = wbytes_all + int(x_p.size) * wd_b + Bp * Op * 4
    vlim = int(min(_VMEM_BUDGET, max(32 * 1024 * 1024, 1.5 * vmem_est(tile_b))))

    f = pl.pallas_call(
        amodel_kernel,
        grid=grid,
        in_specs=in_specs,
        out_specs=out_specs,
        out_shape=jax.ShapeDtypeStruct((Bp, Op), jnp.float32),
        scratch_shapes=[pltpu.VMEM((tile_b, Hp), jnp.float32)],
        compiler_params=pltpu.CompilerParams(
            dimension_semantics=("parallel", "arbitrary"),
            vmem_limit_bytes=vlim,
        ),
        cost_estimate=pl.CostEstimate(flops=int(flops), transcendentals=0,
                                      bytes_accessed=int(bytes_accessed)),
    )
    out = f(x_p, w0p, b0p, w1p, b1p, wf1, bf1, wf2, bf2, w4p, b4p)
    return out[:B, :OUT]


def init_params(key, input_size, output_size,
                hidden_full=200, hidden_compress=40):
    """PyTorch-style uniform(-1/sqrt(fan_in), 1/sqrt(fan_in)) init.
    Weights stored transposed as (in_features, out_features); biases (1, out)."""
    def linear(k, fan_in, fan_out):
        kw, kb = jax.random.split(k)
        bound = 1.0 / jnp.sqrt(fan_in)
        w = jax.random.uniform(kw, (fan_in, fan_out), jnp.float32, -bound, bound)
        b = jax.random.uniform(kb, (1, fan_out), jnp.float32, -bound, bound)
        return w, b

    keys = jax.random.split(key, 7)
    w0, b0 = linear(keys[0], input_size, hidden_full)            # level_0_adapt
    w1, b1 = linear(keys[1], hidden_full, hidden_full)           # level_1_fc
    w1c, b1c = linear(keys[2], hidden_full, hidden_compress)     # level_1_compress
    w2, b2 = linear(keys[3], hidden_full, hidden_full)           # level_2_fc
    w2c, b2c = linear(keys[4], hidden_full, hidden_compress)     # level_2_compress
    w3, b3 = linear(keys[5], hidden_full, hidden_full)           # level_3_fc
    w4, b4 = linear(keys[6], hidden_full + 2 * hidden_compress, output_size)
    return (w0, b0, w1, b1, w1c, b1c, w2, b2, w2c, b2c, w3, b3, w4, b4)


def reference_forward(x_nchw, params):
    (w0, b0, w1, b1, w1c, b1c, w2, b2, w2c, b2c, w3, b3, w4, b4) = params
    x = x_nchw.reshape(x_nchw.shape[0], -1)
    h0 = jax.nn.relu(x @ w0 + b0)
    f1 = jax.nn.relu(h0 @ w1 + b1)
    f2 = jax.nn.relu(f1 @ w2 + b2)
    s1 = f1 @ w1c + b1c
    s2 = f2 @ w2c + b2c
    f3 = jax.nn.relu(f2 @ w3 + b3)
    summary = jnp.concatenate([f3, s1, s2], axis=1)
    return summary @ w4 + b4


if __name__ == "__main__":
    # NCHW images flattened to input_size = C*H*W.
    B, Cc, Hs, Ws = 2, 4, 16, 16
    input_size = Cc * Hs * Ws          # 1024
    output_size = 10

    key = jax.random.PRNGKey(0)
    kx, kp = jax.random.split(key)
    x = jax.random.normal(kx, (B, Cc, Hs, Ws), dtype=jnp.float32)
    params = init_params(kp, input_size, output_size)

    ref = reference_forward(x, params)

    # f32 weights + f32 x: tight correctness check (padding/fusion are exact).
    out_f32 = jax.block_until_ready(
        amodel_forward(x, params, weight_dtype=jnp.float32))
    assert out_f32.shape == (B, output_size)
    assert jnp.allclose(out_f32, ref, atol=2e-4, rtol=2e-4), \
        float(jnp.max(jnp.abs(out_f32 - ref)))

    # default path: bf16 x + bf16 weights, f32 accumulation: loose check.
    out_bf16 = jax.block_until_ready(amodel_forward(x, params))
    assert out_bf16.shape == (B, output_size)
    assert jnp.allclose(out_bf16, ref, atol=2e-1, rtol=2e-1), \
        float(jnp.max(jnp.abs(out_bf16 - ref)))

    print("KERNEL_OK")
</pallas_src>

<mosaic_0001>
module attributes {stable_mosaic.version = 11 : i64} {
  func.func @amodel_kernel(%arg0: i32, %arg1: i32, %arg2: memref<8x1024xf32, #tpu.memory_space<vmem>>, %arg3: memref<1024x256xf32, #tpu.memory_space<vmem>>, %arg4: memref<1x256xf32, #tpu.memory_space<vmem>>, %arg5: memref<256x256xf32, #tpu.memory_space<vmem>>, %arg6: memref<1x256xf32, #tpu.memory_space<vmem>>, %arg7: memref<256x384xf32, #tpu.memory_space<vmem>>, %arg8: memref<1x384xf32, #tpu.memory_space<vmem>>, %arg9: memref<256x384xf32, #tpu.memory_space<vmem>>, %arg10: memref<1x384xf32, #tpu.memory_space<vmem>>, %arg11: memref<512x128xf32, #tpu.memory_space<vmem>>, %arg12: memref<1x128xf32, #tpu.memory_space<vmem>>, %arg13: memref<8x128xf32, #tpu.memory_space<vmem>>, %arg14: memref<8x256xf32, #tpu.memory_space<vmem>>) attributes {dimension_semantics = [#tpu.dimension_semantics<parallel>, #tpu.dimension_semantics<arbitrary>], iteration_bounds = array<i64: 1, 1>, scalar_prefetch = 0 : i64, scratch_operands = 1 : i64, tpu.core_type = #tpu.core_type<tc>, window_params = [{transform_indices = @transform_0, window_bounds = array<i64: 8, 1024>}, {transform_indices = @transform_1, window_bounds = array<i64: 1024, 256>}, {pipeline_mode = #tpu.pipeline_mode<synchronous>, transform_indices = @transform_2, window_bounds = array<i64: 1, 256>}, {pipeline_mode = #tpu.pipeline_mode<synchronous>, transform_indices = @transform_3, window_bounds = array<i64: 256, 256>}, {pipeline_mode = #tpu.pipeline_mode<synchronous>, transform_indices = @transform_4, window_bounds = array<i64: 1, 256>}, {pipeline_mode = #tpu.pipeline_mode<synchronous>, transform_indices = @transform_5, window_bounds = array<i64: 256, 384>}, {pipeline_mode = #tpu.pipeline_mode<synchronous>, transform_indices = @transform_6, window_bounds = array<i64: 1, 384>}, {pipeline_mode = #tpu.pipeline_mode<synchronous>, transform_indices = @transform_7, window_bounds = array<i64: 256, 384>}, {pipeline_mode = #tpu.pipeline_mode<synchronous>, transform_indices = @transform_8, window_bounds = array<i64: 1, 384>}, {pipeline_mode = #tpu.pipeline_mode<synchronous>, transform_indices = @transform_9, window_bounds = array<i64: 512, 128>}, {pipeline_mode = #tpu.pipeline_mode<synchronous>, transform_indices = @transform_10, window_bounds = array<i64: 1, 128>}, {transform_indices = @transform_11, window_bounds = array<i64: 8, 128>}]} {
    %c0_i32 = arith.constant 0 : i32
    %0 = arith.cmpi eq, %arg1, %c0_i32 : i32
    %1 = arith.extui %0 : i1 to i32
    %c0_i32_0 = arith.constant 0 : i32
    %2 = arith.cmpi ne, %1, %c0_i32_0 : i32
    scf.if %2 {
      %cst_10 = arith.constant 0.000000e+00 : f32
      %12 = vector.broadcast %cst_10 : f32 to vector<8x256xf32>
      %c0_11 = arith.constant 0 : index
      %c0_12 = arith.constant 0 : index
      %13 = vector.load %arg14[%c0_11, %c0_12] : memref<8x256xf32, #tpu.memory_space<vmem>>, vector<8x256xf32>
      tpu.vector_store %arg14[%c0_11, %c0_12], %12 {strides = array<i32>} : memref<8x256xf32, #tpu.memory_space<vmem>>, vector<8x256xf32>,
    } else {
    }
    %c0 = arith.constant 0 : index
    %c0_1 = arith.constant 0 : index
    %3 = vector.load %arg14[%c0, %c0_1] : memref<8x256xf32, #tpu.memory_space<vmem>>, vector<8x256xf32>
    %c0_2 = arith.constant 0 : index
    %c0_3 = arith.constant 0 : index
    %4 = vector.load %arg2[%c0_2, %c0_3] : memref<8x1024xf32, #tpu.memory_space<vmem>>, vector<8x1024xf32>
    %c0_4 = arith.constant 0 : index
    %c0_5 = arith.constant 0 : index
    %5 = vector.load %arg3[%c0_4, %c0_5] : memref<1024x256xf32, #tpu.memory_space<vmem>>, vector<1024x256xf32>
    %cst = arith.constant dense<0.000000e+00> : vector<8x256xf32>
    %6 = tpu.matmul %4, %5, %cst {dimension_numbers = #tpu.dot_dimension_numbers<[1], [0], [0], [1], [0, 0, 1, 1], [], []>} : vector<8x1024xf32>, vector<1024x256xf32>, vector<8x256xf32> -> vector<8x256xf32>
    %7 = arith.addf %3, %6 : vector<8x256xf32>
    %c0_6 = arith.constant 0 : index
    %c0_7 = arith.constant 0 : index
    %8 = vector.load %arg14[%c0_6, %c0_7] : memref<8x256xf32, #tpu.memory_space<vmem>>, vector<8x256xf32>
    tpu.vector_store %arg14[%c0_6, %c0_7], %7 {strides = array<i32>} : memref<8x256xf32, #tpu.memory_space<vmem>>, vector<8x256xf32>,
    %c0_i32_8 = arith.constant 0 : i32
    %9 = arith.cmpi eq, %arg1, %c0_i32_8 : i32
    %10 = arith.extui %9 : i1 to i32
    %c0_i32_9 = arith.constant 0 : i32
    %11 = arith.cmpi ne, %10, %c0_i32_9 : i32
    scf.if %11 {
      %c0_10 = arith.constant 0 : index
      %c0_11 = arith.constant 0 : index
      %12 = vector.load %arg14[%c0_10, %c0_11] : memref<8x256xf32, #tpu.memory_space<vmem>>, vector<8x256xf32>
      %c0_12 = arith.constant 0 : index
      %c0_13 = arith.constant 0 : index
      %13 = vector.load %arg4[%c0_12, %c0_13] : memref<1x256xf32, #tpu.memory_space<vmem>>, vector<1x256xf32>
      %14 = vector.broadcast %13 : vector<1x256xf32> to vector<8x256xf32>
      %15 = arith.addf %12, %14 : vector<8x256xf32>
      %cst_14 = arith.constant 0.000000e+00 : f32
      %16 = vector.broadcast %cst_14 : f32 to vector<8x256xf32>
      %17 = arith.maximumf %15, %16 : vector<8x256xf32>
      %c0_15 = arith.constant 0 : index
      %c0_16 = arith.constant 0 : index
      %18 = vector.load %arg5[%c0_15, %c0_16] : memref<256x256xf32, #tpu.memory_space<vmem>>, vector<256x256xf32>
      %cst_17 = arith.constant dense<0.000000e+00> : vector<8x256xf32>
      %19 = tpu.matmul %17, %18, %cst_17 {dimension_numbers = #tpu.dot_dimension_numbers<[1], [0], [0], [1], [0, 0, 1, 1], [], []>} : vector<8x256xf32>, vector<256x256xf32>, vector<8x256xf32> -> vector<8x256xf32>
      %c0_18 = arith.constant 0 : index
      %c0_19 = arith.constant 0 : index
      %20 = vector.load %arg6[%c0_18, %c0_19] : memref<1x256xf32, #tpu.memory_space<vmem>>, vector<1x256xf32>
      %21 = vector.broadcast %20 : vector<1x256xf32> to vector<8x256xf32>
      %22 = arith.addf %19, %21 : vector<8x256xf32>
      %cst_20 = arith.constant 0.000000e+00 : f32
      %23 = vector.broadcast %cst_20 : f32 to vector<8x256xf32>
      %24 = arith.maximumf %22, %23 : vector<8x256xf32>
      %c0_21 = arith.constant 0 : index
      %c0_22 = arith.constant 0 : index
      %25 = vector.load %arg7[%c0_21, %c0_22] : memref<256x384xf32, #tpu.memory_space<vmem>>, vector<256x384xf32>
      %cst_23 = arith.constant dense<0.000000e+00> : vector<8x384xf32>
      %26 = tpu.matmul %24, %25, %cst_23 {dimension_numbers = #tpu.dot_dimension_numbers<[1], [0], [0], [1], [0, 0, 1, 1], [], []>} : vector<8x256xf32>, vector<256x384xf32>, vector<8x384xf32> -> vector<8x384xf32>
      %c0_24 = arith.constant 0 : index
      %c0_25 = arith.constant 0 : index
      %27 = vector.load %arg8[%c0_24, %c0_25] : memref<1x384xf32, #tpu.memory_space<vmem>>, vector<1x384xf32>
      %28 = vector.broadcast %27 : vector<1x384xf32> to vector<8x384xf32>
      %29 = arith.addf %26, %28 : vector<8x384xf32>
      %30 = vector.extract_strided_slice %29 {offsets = [0, 0], sizes = [8, 256], strides = [1, 1]} : vector<8x384xf32> to vector<8x256xf32>
      %cst_26 = arith.constant 0.000000e+00 : f32
      %31 = vector.broadcast %cst_26 : f32 to vector<8x256xf32>
      %32 = arith.maximumf %30, %31 : vector<8x256xf32>
      %33 = vector.extract_strided_slice %29 {offsets = [0, 256], sizes = [8, 128], strides = [1, 1]} : vector<8x384xf32> to vector<8x128xf32>
      %c0_27 = arith.constant 0 : index
      %c0_28 = arith.constant 0 : index
      %34 = vector.load %arg9[%c0_27, %c0_28] : memref<256x384xf32, #tpu.memory_space<vmem>>, vector<256x384xf32>
      %cst_29 = arith.constant dense<0.000000e+00> : vector<8x384xf32>
      %35 = tpu.matmul %32, %34, %cst_29 {dimension_numbers = #tpu.dot_dimension_numbers<[1], [0], [0], [1], [0, 0, 1, 1], [], []>} : vector<8x256xf32>, vector<256x384xf32>, vector<8x384xf32> -> vector<8x384xf32>
      %c0_30 = arith.constant 0 : index
      %c0_31 = arith.constant 0 : index
      %36 = vector.load %arg10[%c0_30, %c0_31] : memref<1x384xf32, #tpu.memory_space<vmem>>, vector<1x384xf32>
      %37 = vector.broadcast %36 : vector<1x384xf32> to vector<8x384xf32>
      %38 = arith.addf %35, %37 : vector<8x384xf32>
      %39 = vector.extract_strided_slice %38 {offsets = [0, 0], sizes = [8, 256], strides = [1, 1]} : vector<8x384xf32> to vector<8x256xf32>
      %cst_32 = arith.constant 0.000000e+00 : f32
      %40 = vector.broadcast %cst_32 : f32 to vector<8x256xf32>
      %41 = arith.maximumf %39, %40 : vector<8x256xf32>
      %42 = vector.extract_strided_slice %38 {offsets = [0, 256], sizes = [8, 128], strides = [1, 1]} : vector<8x384xf32> to vector<8x128xf32>
      %43 = tpu.concatenate %41, %33, %42 in 1 : vector<8x256xf32>, vector<8x128xf32>, vector<8x128xf32> -> vector<8x512xf32>
      %c0_33 = arith.constant 0 : index
      %c0_34 = arith.constant 0 : index
      %44 = vector.load %arg11[%c0_33, %c0_34] : memref<512x128xf32, #tpu.memory_space<vmem>>, vector<512x128xf32>
      %cst_35 = arith.constant dense<0.000000e+00> : vector<8x128xf32>
      %45 = tpu.matmul %43, %44, %cst_35 {dimension_numbers = #tpu.dot_dimension_numbers<[1], [0], [0], [1], [0, 0, 1, 1], [], []>} : vector<8x512xf32>, vector<512x128xf32>, vector<8x128xf32> -> vector<8x128xf32>
      %c0_36 = arith.constant 0 : index
      %c0_37 = arith.constant 0 : index
      %46 = vector.load %arg12[%c0_36, %c0_37] : memref<1x128xf32, #tpu.memory_space<vmem>>, vector<1x128xf32>
      %47 = vector.broadcast %46 : vector<1x128xf32> to vector<8x128xf32>
      %48 = arith.addf %45, %47 : vector<8x128xf32>
      %c0_38 = arith.constant 0 : index
      %c0_39 = arith.constant 0 : index
      %49 = vector.load %arg13[%c0_38, %c0_39] : memref<8x128xf32, #tpu.memory_space<vmem>>, vector<8x128xf32>
      tpu.vector_store %arg13[%c0_38, %c0_39], %48 {strides = array<i32>} : memref<8x128xf32, #tpu.memory_space<vmem>>, vector<8x128xf32>,
    } else {
    }
    return
  }
  func.func @transform_0(%arg0: i32, %arg1: i32) -> (i32, i32) {
    %c0_i32 = arith.constant 0 : i32
    return %arg0, %arg1 : i32, i32
  }
  func.func @transform_1(%arg0: i32, %arg1: i32) -> (i32, i32) {
    %c0_i32 = arith.constant 0 : i32
    %c0_i32_0 = arith.constant 0 : i32
    return %arg1, %c0_i32 : i32, i32
  }
  func.func @transform_2(%arg0: i32, %arg1: i32) -> (i32, i32) {
    %c0_i32 = arith.constant 0 : i32
    %c0_i32_0 = arith.constant 0 : i32
    %c0_i32_1 = arith.constant 0 : i32
    return %c0_i32, %c0_i32_0 : i32, i32
  }
  func.func @transform_3(%arg0: i32, %arg1: i32) -> (i32, i32) {
    %c0_i32 = arith.constant 0 : i32
    %c0_i32_0 = arith.constant 0 : i32
    %c0_i32_1 = arith.constant 0 : i32
    return %c0_i32, %c0_i32_0 : i32, i32
  }
  func.func @transform_4(%arg0: i32, %arg1: i32) -> (i32, i32) {
    %c0_i32 = arith.constant 0 : i32
    %c0_i32_0 = arith.constant 0 : i32
    %c0_i32_1 = arith.constant 0 : i32
    return %c0_i32, %c0_i32_0 : i32, i32
  }
  func.func @transform_5(%arg0: i32, %arg1: i32) -> (i32, i32) {
    %c0_i32 = arith.constant 0 : i32
    %c0_i32_0 = arith.constant 0 : i32
    %c0_i32_1 = arith.constant 0 : i32
    return %c0_i32, %c0_i32_0 : i32, i32
  }
  func.func @transform_6(%arg0: i32, %arg1: i32) -> (i32, i32) {
    %c0_i32 = arith.constant 0 : i32
    %c0_i32_0 = arith.constant 0 : i32
    %c0_i32_1 = arith.constant 0 : i32
    return %c0_i32, %c0_i32_0 : i32, i32
  }
  func.func @transform_7(%arg0: i32, %arg1: i32) -> (i32, i32) {
    %c0_i32 = arith.constant 0 : i32
    %c0_i32_0 = arith.constant 0 : i32
    %c0_i32_1 = arith.constant 0 : i32
    return %c0_i32, %c0_i32_0 : i32, i32
  }
  func.func @transform_8(%arg0: i32, %arg1: i32) -> (i32, i32) {
    %c0_i32 = arith.constant 0 : i32
    %c0_i32_0 = arith.constant 0 : i32
    %c0_i32_1 = arith.constant 0 : i32
    return %c0_i32, %c0_i32_0 : i32, i32
  }
  func.func @transform_9(%arg0: i32, %arg1: i32) -> (i32, i32) {
    %c0_i32 = arith.constant 0 : i32
    %c0_i32_0 = arith.constant 0 : i32
    %c0_i32_1 = arith.constant 0 : i32
    return %c0_i32, %c0_i32_0 : i32, i32
  }
  func.func @transform_10(%arg0: i32, %arg1: i32) -> (i32, i32) {
    %c0_i32 = arith.constant 0 : i32
    %c0_i32_0 = arith.constant 0 : i32
    %c0_i32_1 = arith.constant 0 : i32
    return %c0_i32, %c0_i32_0 : i32, i32
  }
  func.func @transform_11(%arg0: i32, %arg1: i32) -> (i32, i32) {
    %c0_i32 = arith.constant 0 : i32
    %c0_i32_0 = arith.constant 0 : i32
    return %arg0, %c0_i32 : i32, i32
  }
}

</mosaic_0001>

<bundles_post_ra>
// kernel: tpu_custom_call.1
= control target key start
LH: loop header
LB: loop body
LE: loop exit
PB: predicated region body
PF: predicated region fallthrough
CT: control target
= control target key end

     0   :  { %16 = vsyncpa [#allocation4], 0  ;;  %s2755_s0 = inlined_call_operand.hbm [shape: f32[8,1024], index: 0, kind: input, shape index: {}]   ;;  %s2756_s1 = inlined_call_operand.hbm [shape: f32[1024,256], index: 1, kind: input, shape index: {}]   ;;  %s2757_s2 = inlined_call_operand.hbm [shape: f32[1,256], index: 2, kind: input, shape index: {}]   ;;  %s2758_s3 = inlined_call_operand.hbm [shape: f32[256,256], index: 3, kind: input, shape index: {}]   ;;  %s2759_s4 = inlined_call_operand.vmem [shape: f32[1,256], index: 4, kind: input, shape index: {}]   ;;  %s2760_s5 = inlined_call_operand.hbm [shape: f32[256,384], index: 5, kind: input, shape index: {}]   ;;  %s2761_s6 = inlined_call_operand.vmem [shape: f32[1,384], index: 6, kind: input, shape index: {}]   ;;  %s2762_s7 = inlined_call_operand.hbm [shape: f32[256,384], index: 7, kind: input, shape index: {}]   ;;  %s2763_s8 = inlined_call_operand.vmem [shape: f32[1,384], index: 8, kind: input, shape index: {}]   ;;  %s2764_s9 = inlined_call_operand.hbm [shape: f32[512,128], index: 9, kind: input, shape index: {}]   ;;  %s2765_s10 = inlined_call_operand.vmem [shape: f32[1,128], index: 10, kind: input, shape index: {}]   ;;  %s2766_s11 = inlined_call_operand.hbm [shape: f32[8,128], index: 11, kind: output, shape index: {}]  }
   0x1   :  { %17 = vsyncpa [#allocation7], 0 }
   0x2   :  { %18 = vsyncpa [#allocation10], 0 }
   0x3   :  { %19 = vsyncpa [#allocation13], 0 }
   0x4   :  { %20 = vsyncpa [#allocation5], 0  ;;  %s2525_s17 = smov [#allocation6]   ;;  %s2339_s21 = scalar_lea.hbm %s2756_s1, 32768 }
   0x5   :  { %s36_s18 = sshll.u32 %s2525_s17, 4  ;;  %p2340_p0 = scmp.ne.s32.totalorder %s2756_s1, %s2339_s21  ;;  %s37_s18 = int_to_ptr.vmem [resolvable:$true] %s36_s18 }
   0x6   :  { %p2343_p1 = scmp.lt.u32.totalorder %s2339_s21, %s2756_s1 }
   0x8   :  { %p2345_p2 = pnand %p2343_p1, %p2340_p0 }
   0xa   :  { %2348 = shalt.err (!%p2345_p2)
}
   0xb   :  { %s2349_s26 = scalar_lea.vmem %s37_s18, 32768  ;;  %p2354_p4 = scmp.lt.s32.totalorder %s37_s18, %s37_s18 }
   0xc   :  { %p2350_p3 = scmp.ne.s32.totalorder %s37_s18, %s2349_s26  ;;  %p2355_p5 = scmp.lt.s32.totalorder %s2349_s26, %s2349_s26 }
   0xe   :  { %p2356_p6 = por %p2355_p5, %p2354_p4 }
  0x10   :  { %p2357_p7 = pnand %p2356_p6, %p2350_p3 }
  0x12   :  { %2360 = shalt.err (!%p2357_p7)
}
  0x13   :  { %s2526_s27 = smov 256   ;;  %s2527_s28 = smov 16  }
  0x14   :  { %42 = dma.hbm_to_vmem [thread:$0]  %s2756_s1, 32768, %s37_s18, [#allocation7], %s2526_s27, %s2526_s27, %s2527_s28  }
  0x15   :  { %s2528_s12 = smov [#allocation9]   ;;  %s2361_s16 = scalar_lea.hbm %s2758_s3, 8192 }
  0x16   :  { %s58_s13 = sshll.u32 %s2528_s12, 4  ;;  %p2362_p8 = scmp.ne.s32.totalorder %s2758_s3, %s2361_s16  ;;  %s59_s13 = int_to_ptr.vmem [resolvable:$true] %s58_s13 }
  0x17   :  { %p2365_p9 = scmp.lt.u32.totalorder %s2361_s16, %s2758_s3 }
  0x19   :  { %p2367_p10 = pnand %p2365_p9, %p2362_p8 }
  0x1b   :  { %2370 = shalt.err (!%p2367_p10)
}
  0x1c   :  { %s2371_s22 = scalar_lea.vmem %s59_s13, 8192  ;;  %p2376_p12 = scmp.lt.s32.totalorder %s59_s13, %s59_s13 }
  0x1d   :  { %p2372_p11 = scmp.ne.s32.totalorder %s59_s13, %s2371_s22  ;;  %p2377_p13 = scmp.lt.s32.totalorder %s2371_s22, %s2371_s22 }
  0x1f   :  { %p2378_p0 = por %p2377_p13, %p2376_p12 }
  0x21   :  { %p2379_p1 = pnand %p2378_p0, %p2372_p11 }
  0x23   :  { %2382 = shalt.err (!%p2379_p1)
}
  0x24   :  { %64 = dma.hbm_to_vmem [thread:$0]  %s2758_s3, 8192, %s59_s13, [#allocation10], %s2526_s27, %s2526_s27, %s2527_s28  }
  0x25   :  { %s2529_s23 = smov [#allocation12]   ;;  %s2530_s25 = smov [#allocation3]  }
  0x26   :  { %s86_s24 = sshll.u32 %s2529_s23, 4  ;;  %s27_s26 = sshll.u32 %s2530_s25, 4  ;;  %s87_s24 = int_to_ptr.vmem [resolvable:$true] %s86_s24  ;;  %s28_s26 = int_to_ptr.vmem [resolvable:$true] %s27_s26 }
  0x27   :  { %s2383_s12 = scalar_lea.hbm %s2762_s7, 12288 }
  0x28   :  { %p2384_p2 = scmp.ne.s32.totalorder %s2762_s7, %s2383_s12  ;;  %p2387_p3 = scmp.lt.u32.totalorder %s2383_s12, %s2762_s7 }
  0x2a   :  { %p2389_p4 = pnand %p2387_p3, %p2384_p2 }
  0x2c   :  { %2392 = shalt.err (!%p2389_p4)
}
  0x2d   :  { %s2393_s3 = scalar_lea.vmem %s87_s24, 12288  ;;  %p2398_p6 = scmp.lt.s32.totalorder %s87_s24, %s87_s24 }
  0x2e   :  { %p2394_p5 = scmp.ne.s32.totalorder %s87_s24, %s2393_s3  ;;  %p2399_p7 = scmp.lt.s32.totalorder %s2393_s3, %s2393_s3 }
  0x30   :  { %p2400_p8 = por %p2399_p7, %p2398_p6 }
  0x32   :  { %p2401_p9 = pnand %p2400_p8, %p2394_p5 }
  0x34   :  { %2404 = shalt.err (!%p2401_p9)
}
  0x35   :  { %s2531_s27 = smov 384   ;;  %s2532_s28 = smov 24  }
  0x36   :  { %92 = dma.hbm_to_vmem [thread:$0]  %s2762_s7, 12288, %s87_s24, [#allocation13], %s2531_s27, %s2531_s27, %s2532_s28  }
  0x37   :  { %s2405_s22 = scalar_lea.hbm %s2755_s0, 1024 }
  0x38   :  { %p2406_p10 = scmp.ne.s32.totalorder %s2755_s0, %s2405_s22  ;;  %p2409_p11 = scmp.lt.u32.totalorder %s2405_s22, %s2755_s0 }
  0x3a   :  { %p2411_p12 = pnand %p2409_p11, %p2406_p10 }
  0x3c   :  { %2414 = shalt.err (!%p2411_p12)
}
  0x3d   :  { %s2415_s29 = scalar_lea.vmem %s28_s26, 1024  ;;  %p2420_p0 = scmp.lt.s32.totalorder %s28_s26, %s28_s26 }
  0x3e   :  { %p2416_p13 = scmp.ne.s32.totalorder %s28_s26, %s2415_s29  ;;  %p2421_p1 = scmp.lt.s32.totalorder %s2415_s29, %s2415_s29 }
  0x40   :  { %p2422_p2 = por %p2421_p1, %p2420_p0 }
  0x42   :  { %p2423_p3 = pnand %p2422_p2, %p2416_p13 }
  0x44   :  { %2426 = shalt.err (!%p2423_p3)
}
  0x45   :  { %30 = dma.hbm_to_vmem [thread:$0]  %s2755_s0, 1024, %s28_s26, [#allocation4]  }
  0x46   :  { %s2533_s30 = smov [#allocation8]   ;;  %s2534_s14 = smov [#allocation11]  }
  0x47   :  { %s49_s12 = sshll.u32 %s2533_s30, 4  ;;  %s72_s15 = sshll.u32 %s2534_s14, 4  ;;  %s50_s12 = int_to_ptr.vmem [resolvable:$true] %s49_s12  ;;  %s2650_s15 = int_to_ptr.vmem [resolvable:$true] %s72_s15 }
  0x48   :  { %s2427_s3 = scalar_lea.hbm %s2757_s2, 32 }
  0x49   :  { %p2428_p4 = scmp.ne.s32.totalorder %s2757_s2, %s2427_s3  ;;  %p2431_p5 = scmp.lt.u32.totalorder %s2427_s3, %s2757_s2 }
  0x4b   :  { %p2433_p6 = pnand %p2431_p5, %p2428_p4 }
  0x4d   :  { %2436 = shalt.err (!%p2433_p6)
}
  0x4e   :  { %s2437_s0 = scalar_lea.vmem %s50_s12, 32  ;;  %p2442_p8 = scmp.lt.s32.totalorder %s50_s12, %s50_s12 }
  0x4f   :  { %p2438_p7 = scmp.ne.s32.totalorder %s50_s12, %s2437_s0  ;;  %p2443_p9 = scmp.lt.s32.totalorder %s2437_s0, %s2437_s0 }
  0x51   :  { %p2444_p10 = por %p2443_p9, %p2442_p8 }
  0x53   :  { %p2445_p11 = pnand %p2444_p10, %p2438_p7 }
  0x55   :  { %2448 = shalt.err (!%p2445_p11)
}
  0x56   :  { %52 = dma.hbm_to_vmem [thread:$0]  %s2757_s2, 32, %s50_s12, [#allocation7]  }
  0x57   :  { %s2449_s23 = scalar_lea.hbm %s2760_s5, 12288 }
  0x58   :  { %p2450_p12 = scmp.ne.s32.totalorder %s2760_s5, %s2449_s23  ;;  %p2453_p13 = scmp.lt.u32.totalorder %s2449_s23, %s2760_s5 }
  0x5a   :  { %p2455_p0 = pnand %p2453_p13, %p2450_p12 }
  0x5c   :  { %2458 = shalt.err (!%p2455_p0)
}
  0x5d   :  { %s2459_s30 = scalar_lea.vmem %s2650_s15, 12288  ;;  %p2464_p2 = scmp.lt.s32.totalorder %s2650_s15, %s2650_s15 }
  0x5e   :  { %p2460_p1 = scmp.ne.s32.totalorder %s2650_s15, %s2459_s30  ;;  %p2465_p3 = scmp.lt.s32.totalorder %s2459_s30, %s2459_s30 }
  0x60   :  { %p2466_p4 = por %p2465_p3, %p2464_p2 }
  0x62   :  { %p2467_p5 = pnand %p2466_p4, %p2460_p1 }
  0x64   :  { %2470 = shalt.err (!%p2467_p5)
}
  0x65   :  { %78 = dma.hbm_to_vmem [thread:$0]  %s2760_s5, 12288, %s2650_s15, [#allocation10], %s2531_s27, %s2531_s27, %s2532_s28  }
  0x66   :  { %s2535_s14 = smov [#allocation14]   ;;  %s2471_s13 = scalar_lea.hbm %s2764_s9, 8192 }
  0x67   :  { %s100_s16 = sshll.u32 %s2535_s14, 4  ;;  %p2472_p6 = scmp.ne.s32.totalorder %s2764_s9, %s2471_s13  ;;  %s101_s16 = int_to_ptr.vmem [resolvable:$true] %s100_s16 }
  0x68   :  { %p2475_p7 = scmp.lt.u32.totalorder %s2471_s13, %s2764_s9 }
  0x6a   :  { %p2477_p8 = pnand %p2475_p7, %p2472_p6 }
  0x6c   :  { %2480 = shalt.err (!%p2477_p8)
}
  0x6d   :  { %s2481_s26 = scalar_lea.vmem %s101_s16, 8192  ;;  %p2486_p10 = scmp.lt.s32.totalorder %s101_s16, %s101_s16 }
  0x6e   :  { %p2482_p9 = scmp.ne.s32.totalorder %s101_s16, %s2481_s26  ;;  %p2487_p11 = scmp.lt.s32.totalorder %s2481_s26, %s2481_s26 }
  0x70   :  { %p2488_p12 = por %p2487_p11, %p2486_p10 }
  0x72   :  { %p2489_p13 = pnand %p2488_p12, %p2482_p9 }
  0x74   :  { %2492 = shalt.err (!%p2489_p13)
}
  0x75   :  { %s2536_s5 = smov 128   ;;  %s2537_s27 = smov 8  }
  0x76   :  { %106 = dma.hbm_to_vmem [thread:$0]  %s2764_s9, 8192, %s101_s16, [#allocation13], %s2536_s5, %s2536_s5, %s2537_s27  }
  0x77   :  { %2515 = dma.done.wait [#allocation4], 1024  }
  0x78   :  { %2516 = vsyncadd [#allocation4], 4294966272 }
  0x79   :  { %2517 = dma.done.wait [#allocation7], 32800  }
  0x7a   :  { %2518 = vsyncadd [#allocation7], 4294934496 }
  0x7b   :  { %2519 = dma.done.wait [#allocation10], 20480  }
  0x7c   :  { %2520 = vsyncadd [#allocation10], 4294946816 }
  0x7d   :  { %2521 = dma.done.wait [#allocation13], 20480  }
  0x7e   :  { %2522 = vsyncadd [#allocation13], 4294946816  ;;  %v147_v0 = vld [vmem:[#allocation6 + $0x8] sm:$0xff]  ;;  %v149_v1 = vld [vmem:[#allocation6 + $0x18] sm:$0xff]  ;;  %s2538_s25 = smov [#allocation15]  }
  0x7f   :  { %v146_v2 = vld [vmem:[#allocation6] sm:$0xff]  ;;  %v1743_v3 = vpack.c.bf16 %v149_v1, %v147_v0  ;;  %v148_v4 = vld [vmem:[#allocation6 + $0x10] sm:$0xff]  ;;  %v151_v5 = vld [vmem:[#allocation6 + $0x28] sm:$0xff]  ;;  %s1590_s29 = sshll.u32 %s2538_s25, 4  ;;  %s1591_s29 = int_to_ptr.vmem [resolvable:$true] %s1590_s29 }
  0x80   :  { %v153_v6 = vld [vmem:[#allocation6 + $0x38] sm:$0xff]  ;;  %v1745_v7 = vpack.c.bf16 %v148_v4, %v146_v2  ;;  %v150_v9 = vld [vmem:[#allocation6 + $0x20] sm:$0xff]  ;;  %v152_v10 = vld [vmem:[#allocation6 + $0x30] sm:$0xff]  ;;  %s2493_s7 = scalar_lea.vmem %s1591_s29, 128  ;;  %p2498_p1 = scmp.lt.s32.totalorder %s1591_s29, %s1591_s29 }
  0x81   :  { %v1747_v8 = vpack.c.bf16 %v153_v6, %v151_v5  ;;  %v155_v11 = vld [vmem:[#allocation6 + $0x48] sm:$0xff]  ;;  %1744 = vmatprep.subr.bf16.mxu0 %v1743_v3  ;;  %v157_v12 = vld [vmem:[#allocation6 + $0x58] sm:$0xff]  ;;  %v1749_v13 = vpack.c.bf16 %v152_v10, %v150_v9  ;;  %v154_v15 = vld [vmem:[#allocation6 + $0x40] sm:$0xff]  ;;  %p2494_p0 = scmp.ne.s32.totalorder %s1591_s29, %s2493_s7  ;;  %p2499_p2 = scmp.lt.s32.totalorder %s2493_s7, %s2493_s7 }
  0x82   :  { %1746 = vmatpush1.bf16.msra.mxu0 %v1745_v7  ;;  %v1751_v14 = vpack.c.bf16 %v157_v12, %v155_v11  ;;  %v156_v16 = vld [vmem:[#allocation6 + $0x50] sm:$0xff]  ;;  %v159_v17 = vld [vmem:[#allocation6 + $0x68] sm:$0xff]  ;;  %v161_v18 = vld [vmem:[#allocation6 + $0x78] sm:$0xff] }
  0x83   :  { %1748 = vmatprep.subr.bf16.mxu0 %v1747_v8  ;;  %v1753_v19 = vpack.c.bf16 %v156_v16, %v154_v15  ;;  %v1755_v20 = vpack.c.bf16 %v161_v18, %v159_v17  ;;  %v158_v21 = vld [vmem:[#allocation6 + $0x60] sm:$0xff]  ;;  %v160_v22 = vld [vmem:[#allocation6 + $0x70] sm:$0xff]  ;;  %v163_v23 = vld [vmem:[#allocation6 + $0x88] sm:$0xff]  ;;  %p2500_p3 = por %p2499_p2, %p2498_p1 }
  0x84   :  { %v165_v24 = vld [vmem:[#allocation6 + $0x98] sm:$0xff]  ;;  %v1757_v25 = vpack.c.bf16 %v160_v22, %v158_v21  ;;  %v162_v27 = vld [vmem:[#allocation6 + $0x80] sm:$0xff]  ;;  %v164_v28 = vld [vmem:[#allocation6 + $0x90] sm:$0xff] }
  0x85   :  { %v1759_v26 = vpack.c.bf16 %v165_v24, %v163_v23  ;;  %v167_v29 = vld [vmem:[#allocation6 + $0xa8] sm:$0xff]  ;;  %v169_v30 = vld [vmem:[#allocation6 + $0xb8] sm:$0xff]  ;;  %v1761_v31 = vpack.c.bf16 %v164_v28, %v162_v27  ;;  %v166_v33 = vld [vmem:[#allocation6 + $0xa0] sm:$0xff]  ;;  %p2501_p4 = pnand %p2500_p3, %p2494_p0 }
  0x86   :  { %1750 = vmatpush1.bf16.msra.mxu0 %v1749_v13  ;;  %v1763_v32 = vpack.c.bf16 %v169_v30, %v167_v29  ;;  %v168_v34 = vld [vmem:[#allocation6 + $0xb0] sm:$0xff]  ;;  %v171_v35 = vld [vmem:[#allocation6 + $0xc8] sm:$0xff]  ;;  %v173_v36 = vld [vmem:[#allocation6 + $0xd8] sm:$0xff] }
  0x87   :  { %1752 = vmatprep.subr.bf16.mxu0 %v1751_v14  ;;  %v1765_v37 = vpack.c.bf16 %v168_v34, %v166_v33  ;;  %v1767_v38 = vpack.c.bf16 %v173_v36, %v171_v35  ;;  %v170_v39 = vld [vmem:[#allocation6 + $0xc0] sm:$0xff]  ;;  %v172_v40 = vld [vmem:[#allocation6 + $0xd0] sm:$0xff]  ;;  %v139_v41 = vld [vmem:[#allocation3 + $0x8] sm:$0xff] }
  0x88   :  { %v175_v42 = vld [vmem:[#allocation6 + $0xe8] sm:$0xff]  ;;  %v177_v43 = vld [vmem:[#allocation6 + $0xf8] sm:$0xff]  ;;  %466 = vmatprep.mubr.f32.mxu0 %v139_v41  ;;  %v1769_v44 = vpack.c.bf16 %v172_v40, %v170_v39  ;;  %v174_v46 = vld [vmem:[#allocation6 + $0xe0] sm:$0xff] }
  0x89   :  { %v1771_v45 = vpack.c.bf16 %v177_v43, %v175_v42  ;;  %v176_v47 = vld [vmem:[#allocation6 + $0xf0] sm:$0xff]  ;;  %v179_v48 = vld [vmem:[#allocation6 + $0x108] sm:$0xff]  ;;  %v181_v49 = vld [vmem:[#allocation6 + $0x118] sm:$0xff] }
  0x8a   :  { %1754 = vmatpush1.bf16.msra.mxu0 %v1753_v19  ;;  %v1773_v50 = vpack.c.bf16 %v176_v47, %v174_v46  ;;  %v1775_v51 = vpack.c.bf16 %v181_v49, %v179_v48  ;;  %v178_v52 = vld [vmem:[#allocation6 + $0x100] sm:$0xff]  ;;  %v180_v53 = vld [vmem:[#allocation6 + $0x110] sm:$0xff]  ;;  %v183_v54 = vld [vmem:[#allocation6 + $0x128] sm:$0xff] }
  0x8b   :  { %1756 = vmatprep.subr.bf16.mxu0 %v1755_v20  ;;  %v185_v55 = vld [vmem:[#allocation6 + $0x138] sm:$0xff]  ;;  %v1777_v56 = vpack.c.bf16 %v180_v53, %v178_v52  ;;  %v182_v58 = vld [vmem:[#allocation6 + $0x120] sm:$0xff]  ;;  %v184_v59 = vld [vmem:[#allocation6 + $0x130] sm:$0xff] }
  0x8c   :  { %v1779_v57 = vpack.c.bf16 %v185_v55, %v183_v54  ;;  %v187_v60 = vld [vmem:[#allocation6 + $0x148] sm:$0xff]  ;;  %v189_v61 = vld [vmem:[#allocation6 + $0x158] sm:$0xff]  ;;  %v1781_v62 = vpack.c.bf16 %v184_v59, %v182_v58  ;;  %v186_v0 = vld [vmem:[#allocation6 + $0x140] sm:$0xff] }
  0x8d   :  { %v1783_v63 = vpack.c.bf16 %v189_v61, %v187_v60  ;;  %v188_v1 = vld [vmem:[#allocation6 + $0x150] sm:$0xff]  ;;  %v191_v2 = vld [vmem:[#allocation6 + $0x168] sm:$0xff]  ;;  %v193_v3 = vld [vmem:[#allocation6 + $0x178] sm:$0xff] }
  0x8e   :  { %1758 = vmatpush1.bf16.msra.mxu0 %v1757_v25  ;;  %v1785_v4 = vpack.c.bf16 %v188_v1, %v186_v0  ;;  %v1787_v5 = vpack.c.bf16 %v193_v3, %v191_v2  ;;  %v190_v6 = vld [vmem:[#allocation6 + $0x160] sm:$0xff]  ;;  %v192_v7 = vld [vmem:[#allocation6 + $0x170] sm:$0xff]  ;;  %v195_v8 = vld [vmem:[#allocation6 + $0x188] sm:$0xff] }
  0x8f   :  { %1760 = vmatprep.subr.bf16.mxu0 %v1759_v26  ;;  %v197_v9 = vld [vmem:[#allocation6 + $0x198] sm:$0xff]  ;;  %v1789_v10 = vpack.c.bf16 %v192_v7, %v190_v6  ;;  %v194_v12 = vld [vmem:[#allocation6 + $0x180] sm:$0xff]  ;;  %v196_v13 = vld [vmem:[#allocation6 + $0x190] sm:$0xff] }
  0x90   :  { %v1791_v11 = vpack.c.bf16 %v197_v9, %v195_v8  ;;  %v199_v14 = vld [vmem:[#allocation6 + $0x1a8] sm:$0xff]  ;;  %v201_v15 = vld [vmem:[#allocation6 + $0x1b8] sm:$0xff]  ;;  %v1793_v16 = vpack.c.bf16 %v196_v13, %v194_v12  ;;  %v198_v18 = vld [vmem:[#allocation6 + $0x1a0] sm:$0xff] }
  0x91   :  { %v1795_v17 = vpack.c.bf16 %v201_v15, %v199_v14  ;;  %v200_v19 = vld [vmem:[#allocation6 + $0x1b0] sm:$0xff]  ;;  %v203_v20 = vld [vmem:[#allocation6 + $0x1c8] sm:$0xff]  ;;  %v205_v21 = vld [vmem:[#allocation6 + $0x1d8] sm:$0xff] }
  0x92   :  { %1762 = vmatpush1.bf16.msra.mxu0 %v1761_v31  ;;  %v1797_v22 = vpack.c.bf16 %v200_v19, %v198_v18  ;;  %v1799_v23 = vpack.c.bf16 %v205_v21, %v203_v20  ;;  %v202_v24 = vld [vmem:[#allocation6 + $0x1c0] sm:$0xff]  ;;  %v204_v25 = vld [vmem:[#allocation6 + $0x1d0] sm:$0xff]  ;;  %v207_v26 = vld [vmem:[#allocation6 + $0x1e8] sm:$0xff] }
  0x93   :  { %1764 = vmatprep.subr.bf16.mxu0 %v1763_v32  ;;  %v209_v27 = vld [vmem:[#allocation6 + $0x1f8] sm:$0xff]  ;;  %v1801_v28 = vpack.c.bf16 %v204_v25, %v202_v24  ;;  %v206_v30 = vld [vmem:[#allocation6 + $0x1e0] sm:$0xff]  ;;  %v208_v31 = vld [vmem:[#allocation6 + $0x1f0] sm:$0xff] }
  0x94   :  { %v1803_v29 = vpack.c.bf16 %v209_v27, %v207_v26  ;;  %v211_v32 = vld [vmem:[#allocation6 + $0x208] sm:$0xff]  ;;  %v213_v33 = vld [vmem:[#allocation6 + $0x218] sm:$0xff]  ;;  %v1805_v34 = vpack.c.bf16 %v208_v31, %v206_v30  ;;  %v210_v36 = vld [vmem:[#allocation6 + $0x200] sm:$0xff] }
  0x95   :  { %v1807_v35 = vpack.c.bf16 %v213_v33, %v211_v32  ;;  %v217_v39 = vld [vmem:[#allocation6 + $0x238] sm:$0xff]  ;;  %v138_v40 = vld [vmem:[#allocation3] sm:$0xff]  ;;  %v219_v46 = vld [vmem:[#allocation6 + $0x248] sm:$0xff] }
  0x96   :  { %1766 = vmatpush1.bf16.msra.mxu0 %v1765_v37  ;;  %v212_v37 = vld [vmem:[#allocation6 + $0x210] sm:$0xff]  ;;  %v214_v43 = vld [vmem:[#allocation6 + $0x220] sm:$0xff]  ;;  %v221_v47 = vld [vmem:[#allocation6 + $0x258] sm:$0xff] }
  0x97   :  { %1768 = vmatprep.subr.bf16.mxu0 %v1767_v38  ;;  %v215_v38 = vld [vmem:[#allocation6 + $0x228] sm:$0xff]  ;;  %v1809_v41 = vpack.c.bf16 %v212_v37, %v210_v36  ;;  %v1815_v49 = vpack.c.bf16 %v221_v47, %v219_v46  ;;  %v225_v53 = vld [vmem:[#allocation6 + $0x278] sm:$0xff]  ;;  %v258_v46 = vld [vmem:[#allocation6 + $0x380] sm:$0xff] }
  0x98   :  { %v1811_v42 = vpack.c.bf16 %v217_v39, %v215_v38  ;;  %v223_v52 = vld [vmem:[#allocation6 + $0x268] sm:$0xff]  ;;  %v229_v59 = vld [vmem:[#allocation6 + $0x298] sm:$0xff]  ;;  %v260_v47 = vld [vmem:[#allocation6 + $0x390] sm:$0xff] }
  0x99   :  { %v1819_v55 = vpack.c.bf16 %v225_v53, %v223_v52  ;;  %v227_v58 = vld [vmem:[#allocation6 + $0x288] sm:$0xff]  ;;  %v233_v1 = vld [vmem:[#allocation6 + $0x2b8] sm:$0xff]  ;;  %v262_v52 = vld [vmem:[#allocation6 + $0x3a0] sm:$0xff] }
  0x9a   :  { %1770 = vmatpush1.bf16.msra.mxu0 %v1769_v44  ;;  %v216_v44 = vld [vmem:[#allocation6 + $0x230] sm:$0xff]  ;;  %v1823_v61 = vpack.c.bf16 %v229_v59, %v227_v58  ;;  %v231_v0 = vld [vmem:[#allocation6 + $0x2a8] sm:$0xff]  ;;  %v237_v7 = vld [vmem:[#allocation6 + $0x2d8] sm:$0xff] }
  0x9b   :  { %1772 = vmatprep.subr.bf16.mxu0 %v1771_v45  ;;  %v141_v45 = vld [vmem:[#allocation3 + $0x18] sm:$0xff]  ;;  %v1813_v48 = vpack.c.bf16 %v216_v44, %v214_v43  ;;  %v1827_v3 = vpack.c.bf16 %v233_v1, %v231_v0  ;;  %v235_v6 = vld [vmem:[#allocation6 + $0x2c8] sm:$0xff]  ;;  %v264_v53 = vld [vmem:[#allocation6 + $0x3b0] sm:$0xff] }
  0x9c   :  { %v1831_v9 = vpack.c.bf16 %v237_v7, %v235_v6  ;;  %v239_v12 = vld [vmem:[#allocation6 + $0x2e8] sm:$0xff]  ;;  %v241_v13 = vld [vmem:[#allocation6 + $0x2f8] sm:$0xff]  ;;  %v266_v58 = vld [vmem:[#allocation6 + $0x3c0] sm:$0xff] }
  0x9d   :  { %v1835_v15 = vpack.c.bf16 %v241_v13, %v239_v12  ;;  %v243_v18 = vld [vmem:[#allocation6 + $0x308] sm:$0xff]  ;;  %v245_v19 = vld [vmem:[#allocation6 + $0x318] sm:$0xff]  ;;  %v268_v59 = vld [vmem:[#allocation6 + $0x3d0] sm:$0xff] }
  0x9e   :  { %1774 = vmatpush1.bf16.msra.mxu0 %v1773_v50  ;;  %v218_v50 = vld [vmem:[#allocation6 + $0x240] sm:$0xff]  ;;  %v1839_v21 = vpack.c.bf16 %v245_v19, %v243_v18  ;;  %v247_v24 = vld [vmem:[#allocation6 + $0x328] sm:$0xff]  ;;  %v249_v25 = vld [vmem:[#allocation6 + $0x338] sm:$0xff] }
  0x9f   :  { %1776 = vmatprep.subr.bf16.mxu0 %v1775_v51  ;;  %v220_v51 = vld [vmem:[#allocation6 + $0x250] sm:$0xff]  ;;  %v1843_v27 = vpack.c.bf16 %v249_v25, %v247_v24  ;;  %v251_v30 = vld [vmem:[#allocation6 + $0x348] sm:$0xff]  ;;  %v253_v31 = vld [vmem:[#allocation6 + $0x358] sm:$0xff] }
  0xa0   :  { %v1817_v54 = vpack.c.bf16 %v220_v51, %v218_v50  ;;  %v1847_v33 = vpack.c.bf16 %v253_v31, %v251_v30  ;;  %v255_v36 = vld [vmem:[#allocation6 + $0x368] sm:$0xff]  ;;  %v257_v37 = vld [vmem:[#allocation6 + $0x378] sm:$0xff]  ;;  %v1857_v50 = vpack.c.bf16 %v260_v47, %v258_v46  ;;  %v270_v0 = vld [vmem:[#allocation6 + $0x3e0] sm:$0xff] }
  0xa1   :  { %v1851_v39 = vpack.c.bf16 %v257_v37, %v255_v36  ;;  %v261_v43 = vld [vmem:[#allocation6 + $0x398] sm:$0xff]  ;;  %v272_v1 = vld [vmem:[#allocation6 + $0x3f0] sm:$0xff]  ;;  %v274_v6 = vld [vmem:[#allocation6 + $0x400] sm:$0xff] }
  0xa2   :  { %1778 = vmatpush1.bf16.msra.mxu0 %v1777_v56  ;;  %v222_v56 = vld [vmem:[#allocation6 + $0x260] sm:$0xff]  ;;  %v276_v7 = vld [vmem:[#allocation6 + $0x410] sm:$0xff]  ;;  %v291_v47 = vld [vmem:[#allocation6 + $0x488] sm:$0xff] }
  0xa3   :  { %1780 = vmatprep.subr.bf16.mxu0 %v1779_v57  ;;  %v224_v57 = vld [vmem:[#allocation6 + $0x270] sm:$0xff]  ;;  %v278_v13 = vld [vmem:[#allocation6 + $0x420] sm:$0xff] }
  0xa4   :  { %v1821_v60 = vpack.c.bf16 %v224_v57, %v222_v56  ;;  %v1861_v56 = vpack.c.bf16 %v264_v53, %v262_v52  ;;  %v282_v18 = vld [vmem:[#allocation6 + $0x440] sm:$0xff]  ;;  %v284_v19 = vld [vmem:[#allocation6 + $0x450] sm:$0xff] }
  0xa5   :  { %v713_v25 = vld [vmem:[#allocation9 + $0x10] sm:$0xff]  ;;  %v715_v31 = vld [vmem:[#allocation9 + $0x20] sm:$0xff]  ;;  %v722_v36 = vld [vmem:[#allocation9 + $0x58] sm:$0xff] }
  0xa6   :  { %1782 = vmatpush1.bf16.msra.mxu0 %v1781_v62  ;;  %v226_v62 = vld [vmem:[#allocation6 + $0x280] sm:$0xff] }
  0xa7   :  { %1784 = vmatprep.subr.bf16.mxu0 %v1783_v63  ;;  %v228_v63 = vld [vmem:[#allocation6 + $0x290] sm:$0xff]  ;;  %v726_v46 = vld [vmem:[#allocation9 + $0x78] sm:$0xff]  ;;  %v723_v53 = vld [vmem:[#allocation9 + $0x60] sm:$0xff] }
  0xa8   :  { %v1825_v2 = vpack.c.bf16 %v228_v63, %v226_v62  ;;  %v1865_v62 = vpack.c.bf16 %v268_v59, %v266_v58  ;;  %v730_v58 = vld [vmem:[#allocation9 + $0x98] sm:$0xff]  ;;  %v295_v59 = vld [vmem:[#allocation6 + $0x4a8] sm:$0xff] }
  0xaa   :  { %1786 = vmatpush1.bf16.msra.mxu0 %v1785_v4  ;;  %v230_v4 = vld [vmem:[#allocation6 + $0x2a0] sm:$0xff] }
  0xab   :  { %1788 = vmatprep.subr.bf16.mxu0 %v1787_v5  ;;  %v232_v5 = vld [vmem:[#allocation6 + $0x2b0] sm:$0xff] }
  0xac   :  { %v1829_v8 = vpack.c.bf16 %v232_v5, %v230_v4  ;;  %v1869_v4 = vpack.c.bf16 %v272_v1, %v270_v0  ;;  %v727_v1 = vld [vmem:[#allocation9 + $0x80] sm:$0xff] }
  0xae   :  { %1790 = vmatpush1.bf16.msra.mxu0 %v1789_v10  ;;  %v234_v10 = vld [vmem:[#allocation6 + $0x2c0] sm:$0xff] }
  0xaf   :  { %1792 = vmatprep.subr.bf16.mxu0 %v1791_v11  ;;  %v236_v11 = vld [vmem:[#allocation6 + $0x2d0] sm:$0xff] }
  0xb0   :  { %v1833_v14 = vpack.c.bf16 %v236_v11, %v234_v10  ;;  %v140_v10 = vld [vmem:[#allocation3 + $0x10] sm:$0xff]  ;;  %v1873_v11 = vpack.c.bf16 %v276_v7, %v274_v6  ;;  %v734_v6 = vld [vmem:[#allocation9 + $0xb8] sm:$0xff]  ;;  %v299_v7 = vld [vmem:[#allocation6 + $0x4c8] sm:$0xff] }
  0xb2   :  { %1794 = vmatpush1.bf16.msra.mxu0 %v1793_v16  ;;  %v238_v16 = vld [vmem:[#allocation6 + $0x2e0] sm:$0xff] }
  0xb3   :  { %1796 = vmatprep.subr.bf16.mxu0 %v1795_v17  ;;  %v240_v17 = vld [vmem:[#allocation6 + $0x2f0] sm:$0xff] }
  0xb4   :  { %v1837_v20 = vpack.c.bf16 %v240_v17, %v238_v16  ;;  %v283_v16 = vld [vmem:[#allocation6 + $0x448] sm:$0xff]  ;;  %v285_v17 = vld [vmem:[#allocation6 + $0x458] sm:$0xff] }
  0xb6   :  { %1798 = vmatpush1.bf16.msra.mxu0 %v1797_v22  ;;  %v242_v22 = vld [vmem:[#allocation6 + $0x300] sm:$0xff] }
  0xb7   :  { %1800 = vmatprep.subr.bf16.mxu0 %v1799_v23  ;;  %v244_v23 = vld [vmem:[#allocation6 + $0x310] sm:$0xff] }
  0xb8   :  { %v1841_v26 = vpack.c.bf16 %v244_v23, %v242_v22  ;;  %v711_v22 = vld [vmem:[#allocation9] sm:$0xff] }
  0xba   :  { %1802 = vmatpush1.bf16.msra.mxu0 %v1801_v28  ;;  %v246_v28 = vld [vmem:[#allocation6 + $0x320] sm:$0xff] }
  0xbb   :  { %1804 = vmatprep.subr.bf16.mxu0 %v1803_v29  ;;  %v248_v29 = vld [vmem:[#allocation6 + $0x330] sm:$0xff] }
  0xbc   :  { %v1845_v32 = vpack.c.bf16 %v248_v29, %v246_v28  ;;  %v1879_v28 = vpack.c.bf16 %v285_v17, %v283_v16  ;;  %v2001_v29 = vpack.c.bf16 %v713_v25, %v711_v22  ;;  %v300_v16 = vld [vmem:[#allocation6 + $0x4d0] sm:$0xff]  ;;  %v735_v25 = vld [vmem:[#allocation9 + $0xc0] sm:$0xff] }
  0xbd   :  { %v736_v17 = vld [vmem:[#allocation9 + $0xc8] sm:$0xff] }
  0xbe   :  { %1806 = vmatpush1.bf16.msra.mxu0 %v1805_v34  ;;  %v250_v34 = vld [vmem:[#allocation6 + $0x340] sm:$0xff] }
  0xbf   :  { %1808 = vmatprep.subr.bf16.mxu0 %v1807_v35  ;;  %v252_v35 = vld [vmem:[#allocation6 + $0x350] sm:$0xff] }
  0xc0   :  { %v1849_v38 = vpack.c.bf16 %v252_v35, %v250_v34  ;;  %v287_v34 = vld [vmem:[#allocation6 + $0x468] sm:$0xff]  ;;  %v289_v35 = vld [vmem:[#allocation6 + $0x478] sm:$0xff] }
  0xc1   :  { %467 = vmatmul.mubr.f32.vlgmr.msra.gmra.mrb[0].mxu0 %v138_v40  ;;  %v254_v40 = vld [vmem:[#allocation6 + $0x360] sm:$0xff] }
  0xc2   :  { %1810 = vmatpush1.bf16.msra.mxu0 %v1809_v41  ;;  %537 = vmatprep.mubr.f32.mxu0 %v141_v45  ;;  %v256_v41 = vld [vmem:[#allocation6 + $0x370] sm:$0xff] }
  0xc3   :  { %1812 = vmatprep.subr.bf16.mxu0 %v1811_v42  ;;  %v259_v42 = vld [vmem:[#allocation6 + $0x388] sm:$0xff]  ;;  %v1853_v44 = vpack.c.bf16 %v256_v41, %v254_v40 }
  0xc4   :  { %v1855_v45 = vpack.c.bf16 %v261_v43, %v259_v42  ;;  %v719_v41 = vld [vmem:[#allocation9 + $0x40] sm:$0xff]  ;;  %v721_v42 = vld [vmem:[#allocation9 + $0x50] sm:$0xff]  ;;  %v1883_v43 = vpack.c.bf16 %v289_v35, %v287_v34 }
  0xc5   :  { %v306_v35 = vld [vmem:[#allocation6 + $0x500] sm:$0xff] }
  0xc6   :  { %1814 = vmatpush1.bf16.msra.mxu0 %v1813_v48  ;;  %v263_v48 = vld [vmem:[#allocation6 + $0x3a8] sm:$0xff] }
  0xc7   :  { %1816 = vmatprep.subr.bf16.mxu0 %v1815_v49  ;;  %v265_v49 = vld [vmem:[#allocation6 + $0x3b8] sm:$0xff] }
  0xc8   :  { %v1859_v51 = vpack.c.bf16 %v265_v49, %v263_v48  ;;  %v293_v48 = vld [vmem:[#allocation6 + $0x498] sm:$0xff]  ;;  %v2009_v49 = vpack.c.bf16 %v721_v42, %v719_v41  ;;  %v744_v41 = vld [vmem:[#allocation9 + $0x108] sm:$0xff] }
  0xc9   :  { %v746_v42 = vld [vmem:[#allocation9 + $0x118] sm:$0xff] }
  0xca   :  { %1818 = vmatpush1.bf16.msra.mxu0 %v1817_v54  ;;  %v267_v54 = vld [vmem:[#allocation6 + $0x3c8] sm:$0xff] }
  0xcb   :  { %1820 = vmatprep.subr.bf16.mxu0 %v1819_v55  ;;  %v269_v55 = vld [vmem:[#allocation6 + $0x3d8] sm:$0xff] }
  0xcc   :  { %v1863_v57 = vpack.c.bf16 %v269_v55, %v267_v54  ;;  %v725_v54 = vld [vmem:[#allocation9 + $0x70] sm:$0xff]  ;;  %v1887_v55 = vpack.c.bf16 %v293_v48, %v291_v47  ;;  %v310_v47 = vld [vmem:[#allocation6 + $0x520] sm:$0xff]  ;;  %v2031_v48 = vpack.c.bf16 %v746_v42, %v744_v41 }
  0xce   :  { %1822 = vmatpush1.bf16.msra.mxu0 %v1821_v60  ;;  %v271_v60 = vld [vmem:[#allocation6 + $0x3e8] sm:$0xff] }
  0xcf   :  { %1824 = vmatprep.subr.bf16.mxu0 %v1823_v61  ;;  %v273_v61 = vld [vmem:[#allocation6 + $0x3f8] sm:$0xff] }
  0xd0   :  { %v1867_v63 = vpack.c.bf16 %v273_v61, %v271_v60  ;;  %v297_v60 = vld [vmem:[#allocation6 + $0x4b8] sm:$0xff]  ;;  %v2013_v61 = vpack.c.bf16 %v725_v54, %v723_v53  ;;  %v748_v53 = vld [vmem:[#allocation9 + $0x128] sm:$0xff] }
  0xd1   :  { %v750_v54 = vld [vmem:[#allocation9 + $0x138] sm:$0xff] }
  0xd2   :  { %1826 = vmatpush1.bf16.msra.mxu0 %v1825_v2  ;;  %v275_v2 = vld [vmem:[#allocation6 + $0x408] sm:$0xff] }
  0xd3   :  { %1828 = vmatprep.subr.bf16.mxu0 %v1827_v3  ;;  %v277_v3 = vld [vmem:[#allocation6 + $0x418] sm:$0xff] }
  0xd4   :  { %v1871_v5 = vpack.c.bf16 %v277_v3, %v275_v2  ;;  %v729_v2 = vld [vmem:[#allocation9 + $0x90] sm:$0xff]  ;;  %v1891_v3 = vpack.c.bf16 %v297_v60, %v295_v59  ;;  %v314_v59 = vld [vmem:[#allocation6 + $0x540] sm:$0xff]  ;;  %v2035_v60 = vpack.c.bf16 %v750_v54, %v748_v53 }
  0xd6   :  { %1830 = vmatpush1.bf16.msra.mxu0 %v1829_v8  ;;  %v279_v8 = vld [vmem:[#allocation6 + $0x428] sm:$0xff] }
  0xd7   :  { %1832 = vmatprep.subr.bf16.mxu0 %v1831_v9  ;;  %v281_v9 = vld [vmem:[#allocation6 + $0x438] sm:$0xff] }
  0xd8   :  { %v1875_v12 = vpack.c.bf16 %v281_v9, %v279_v8  ;;  %v301_v8 = vld [vmem:[#allocation6 + $0x4d8] sm:$0xff]  ;;  %v2017_v9 = vpack.c.bf16 %v729_v2, %v727_v1  ;;  %v752_v1 = vld [vmem:[#allocation9 + $0x148] sm:$0xff] }
  0xd9   :  { %v754_v2 = vld [vmem:[#allocation9 + $0x158] sm:$0xff] }
  0xda   :  { %1834 = vmatpush1.bf16.msra.mxu0 %v1833_v14  ;;  %v280_v14 = vld [vmem:[#allocation6 + $0x430] sm:$0xff] }
  0xdb   :  { %1836 = vmatprep.subr.bf16.mxu0 %v1835_v15  ;;  %v143_v15 = vld [vmem:[#allocation3 + $0x28] sm:$0xff]  ;;  %v1877_v23 = vpack.c.bf16 %v280_v14, %v278_v13  ;;  %v733_v14 = vld [vmem:[#allocation9 + $0xb0] sm:$0xff] }
  0xdc   :  { %v731_v13 = vld [vmem:[#allocation9 + $0xa0] sm:$0xff] }
  0xde   :  { %1838 = vmatpush1.bf16.msra.mxu0 %v1837_v20  ;;  %v712_v20 = vld [vmem:[#allocation9 + $0x8] sm:$0xff] }
  0xdf   :  { %1840 = vmatprep.subr.bf16.mxu0 %v1839_v21  ;;  %v714_v21 = vld [vmem:[#allocation9 + $0x18] sm:$0xff] }
  0xe0   :  { %v1999_v24 = vpack.c.bf16 %v714_v21, %v712_v20  ;;  %v305_v20 = vld [vmem:[#allocation6 + $0x4f8] sm:$0xff]  ;;  %v2021_v21 = vpack.c.bf16 %v733_v14, %v731_v13  ;;  %v756_v13 = vld [vmem:[#allocation9 + $0x168] sm:$0xff] }
  0xe1   :  { %v758_v14 = vld [vmem:[#allocation9 + $0x178] sm:$0xff] }
  0xe2   :  { %1842 = vmatpush1.bf16.msra.mxu0 %v1841_v26  ;;  %v716_v26 = vld [vmem:[#allocation9 + $0x28] sm:$0xff]  ;;  %2000 = vmatprep.subr.bf16.mxu1 %v1999_v24 }
  0xe3   :  { %1844 = vmatprep.subr.bf16.mxu0 %v1843_v27  ;;  %v718_v27 = vld [vmem:[#allocation9 + $0x38] sm:$0xff]  ;;  %2002 = vmatpush1.bf16.msra.mxu1 %v2001_v29  ;;  %v740_v29 = vld [vmem:[#allocation9 + $0xe8] sm:$0xff] }
  0xe4   :  { %v2003_v30 = vpack.c.bf16 %v718_v27, %v716_v26  ;;  %v737_v26 = vld [vmem:[#allocation9 + $0xd0] sm:$0xff] }
  0xe6   :  { %1846 = vmatpush1.bf16.msra.mxu0 %v1845_v32  ;;  %v717_v32 = vld [vmem:[#allocation9 + $0x30] sm:$0xff]  ;;  %2004 = vmatprep.subr.bf16.mxu1 %v2003_v30  ;;  %v742_v30 = vld [vmem:[#allocation9 + $0xf8] sm:$0xff] }
  0xe7   :  { %1848 = vmatprep.subr.bf16.mxu0 %v1847_v33  ;;  %v720_v33 = vld [vmem:[#allocation9 + $0x48] sm:$0xff]  ;;  %v2005_v37 = vpack.c.bf16 %v717_v32, %v715_v31  ;;  %v309_v32 = vld [vmem:[#allocation6 + $0x518] sm:$0xff] }
  0xe8   :  { %v2007_v40 = vpack.c.bf16 %v722_v36, %v720_v33  ;;  %v307_v31 = vld [vmem:[#allocation6 + $0x508] sm:$0xff]  ;;  %v2025_v33 = vpack.c.bf16 %v737_v26, %v735_v25  ;;  %v2027_v36 = vpack.c.bf16 %v742_v30, %v740_v29  ;;  %v762_v26 = vld [vmem:[#allocation9 + $0x198] sm:$0xff] }
  0xe9   :  { %2006 = vmatpush1.bf16.msra.mxu1 %v2005_v37  ;;  %v739_v37 = vld [vmem:[#allocation9 + $0xe0] sm:$0xff]  ;;  %v760_v25 = vld [vmem:[#allocation9 + $0x188] sm:$0xff] }
  0xea   :  { %1850 = vmatpush1.bf16.msra.mxu0 %v1849_v38  ;;  %v1881_v38 = vpack.c.bf16 %v284_v19, %v282_v18  ;;  %2008 = vmatprep.subr.bf16.mxu1 %v2007_v40  ;;  %v738_v18 = vld [vmem:[#allocation9 + $0xd8] sm:$0xff]  ;;  %v303_v19 = vld [vmem:[#allocation6 + $0x4e8] sm:$0xff]  ;;  %v308_v40 = vld [vmem:[#allocation6 + $0x510] sm:$0xff] }
  0xeb   :  { %1852 = vmatprep.subr.bf16.mxu0 %v1851_v39  ;;  %v286_v39 = vld [vmem:[#allocation6 + $0x460] sm:$0xff]  ;;  %v2023_v24 = vpack.c.bf16 %v738_v18, %v736_v17  ;;  %v1899_v27 = vpack.c.bf16 %v305_v20, %v303_v19  ;;  %v2043_v20 = vpack.c.bf16 %v758_v14, %v756_v13  ;;  %v348_v14 = vld [vmem:[#allocation6 + $0x650] sm:$0xff] }
  0xec   :  { %v322_v19 = vld [vmem:[#allocation6 + $0x580] sm:$0xff] }
  0xed   :  { %2010 = vmatpush1.bf16.msra.mxu1 %v2009_v49  ;;  %v743_v49 = vld [vmem:[#allocation9 + $0x100] sm:$0xff] }
  0xee   :  { %1854 = vmatpush1.bf16.msra.mxu0 %v1853_v44  ;;  %v288_v44 = vld [vmem:[#allocation6 + $0x470] sm:$0xff]  ;;  %v346_v13 = vld [vmem:[#allocation6 + $0x640] sm:$0xff] }
  0xef   :  { %1856 = vmatprep.subr.bf16.mxu0 %v1855_v45  ;;  %v724_v45 = vld [vmem:[#allocation9 + $0x68] sm:$0xff] }
  0xf0   :  { %v2011_v52 = vpack.c.bf16 %v726_v46, %v724_v45  ;;  %v1905_v46 = vpack.c.bf16 %v308_v40, %v306_v35  ;;  %v333_v40 = vld [vmem:[#allocation6 + $0x5d8] sm:$0xff] }
  0xf2   :  { %1858 = vmatpush1.bf16.msra.mxu0 %v1857_v50  ;;  %v1885_v50 = vpack.c.bf16 %v288_v44, %v286_v39  ;;  %2012 = vmatprep.subr.bf16.mxu1 %v2011_v52  ;;  %v1903_v39 = vpack.c.bf16 %v309_v32, %v307_v31  ;;  %v313_v44 = vld [vmem:[#allocation6 + $0x538] sm:$0xff]  ;;  %v312_v52 = vld [vmem:[#allocation6 + $0x530] sm:$0xff]  ;;  %v326_v31 = vld [vmem:[#allocation6 + $0x5a0] sm:$0xff]  ;;  %v2047_v32 = vpack.c.bf16 %v762_v26, %v760_v25 }
  0xf3   :  { %1860 = vmatprep.subr.bf16.mxu0 %v1859_v51  ;;  %v290_v51 = vld [vmem:[#allocation6 + $0x480] sm:$0xff]  ;;  %2014 = vmatpush1.bf16.msra.mxu1 %v2013_v61  ;;  %v356_v26 = vld [vmem:[#allocation6 + $0x690] sm:$0xff] }
  0xf4   :  { %v747_v61 = vld [vmem:[#allocation9 + $0x120] sm:$0xff] }
  0xf5   :  { %v354_v25 = vld [vmem:[#allocation6 + $0x680] sm:$0xff] }
  0xf6   :  { %1862 = vmatpush1.bf16.msra.mxu0 %v1861_v56  ;;  %v292_v56 = vld [vmem:[#allocation6 + $0x490] sm:$0xff] }
  0xf7   :  { %1864 = vmatprep.subr.bf16.mxu0 %v1863_v57  ;;  %v728_v57 = vld [vmem:[#allocation9 + $0x88] sm:$0xff] }
  0xf8   :  { %v2015_v0 = vpack.c.bf16 %v730_v58, %v728_v57  ;;  %v1909_v58 = vpack.c.bf16 %v312_v52, %v310_v47  ;;  %v337_v52 = vld [vmem:[#allocation6 + $0x5f8] sm:$0xff] }
  0xfa   :  { %1866 = vmatpush1.bf16.msra.mxu0 %v1865_v62  ;;  %v1889_v62 = vpack.c.bf16 %v292_v56, %v290_v51  ;;  %2016 = vmatprep.subr.bf16.mxu1 %v2015_v0  ;;  %v317_v56 = vld [vmem:[#allocation6 + $0x558] sm:$0xff]  ;;  %v316_v0 = vld [vmem:[#allocation6 + $0x550] sm:$0xff] }
  0xfb   :  { %1868 = vmatprep.subr.bf16.mxu0 %v1867_v63  ;;  %v294_v63 = vld [vmem:[#allocation6 + $0x4a0] sm:$0xff]  ;;  %2018 = vmatpush1.bf16.msra.mxu1 %v2017_v9 }
  0xfc   :  { %v751_v9 = vld [vmem:[#allocation9 + $0x140] sm:$0xff] }
  0xfe   :  { %1870 = vmatpush1.bf16.msra.mxu0 %v1869_v4  ;;  %v296_v4 = vld [vmem:[#allocation6 + $0x4b0] sm:$0xff] }
  0xff   :  { %1872 = vmatprep.subr.bf16.mxu0 %v1871_v5  ;;  %v732_v5 = vld [vmem:[#allocation9 + $0xa8] sm:$0xff] }
 0x101   :  { %538 = vmatmul.mubr.f32.vlgmr.msra.gmra.mrb[0].mxu0 %v140_v10  ;;  %v1893_v10 = vpack.c.bf16 %v296_v4, %v294_v63  ;;  %v321_v4 = vld [vmem:[#allocation6 + $0x578] sm:$0xff] }
 0x102   :  { %1874 = vmatpush1.bf16.msra.mxu0 %v1873_v11  ;;  %608 = vmatprep.mubr.f32.mxu0 %v143_v15  ;;  %v298_v11 = vld [vmem:[#allocation6 + $0x4c0] sm:$0xff]  ;;  %v1895_v15 = vpack.c.bf16 %v301_v8, %v299_v7  ;;  %v2039_v8 = vpack.c.bf16 %v754_v2, %v752_v1  ;;  %v343_v1 = vld [vmem:[#allocation6 + $0x628] sm:$0xff]  ;;  %v345_v2 = vld [vmem:[#allocation6 + $0x638] sm:$0xff] }
 0x103   :  { %1876 = vmatprep.subr.bf16.mxu0 %v1875_v12  ;;  %v2019_v12 = vpack.c.bf16 %v734_v6, %v732_v5  ;;  %v1897_v22 = vpack.c.bf16 %v300_v16, %v298_v11  ;;  %v1913_v6 = vpack.c.bf16 %v316_v0, %v314_v59  ;;  %v318_v7 = vld [vmem:[#allocation6 + $0x560] sm:$0xff]  ;;  %v325_v16 = vld [vmem:[#allocation6 + $0x598] sm:$0xff]  ;;  %v339_v59 = vld [vmem:[#allocation6 + $0x608] sm:$0xff] }
 0x104   :  { %v340_v0 = vld [vmem:[#allocation6 + $0x610] sm:$0xff] }
 0x105   :  { %2020 = vmatprep.subr.bf16.mxu1 %v2019_v12  ;;  %v320_v12 = vld [vmem:[#allocation6 + $0x570] sm:$0xff] }
 0x106   :  { %1878 = vmatpush1.bf16.msra.mxu0 %v1877_v23  ;;  %v302_v23 = vld [vmem:[#allocation6 + $0x4e0] sm:$0xff]  ;;  %2022 = vmatpush1.bf16.msra.mxu1 %v2021_v21  ;;  %v1917_v18 = vpack.c.bf16 %v320_v12, %v318_v7  ;;  %v344_v7 = vld [vmem:[#allocation6 + $0x630] sm:$0xff] }
 0x107   :  { %1880 = vmatprep.subr.bf16.mxu0 %v1879_v28  ;;  %v304_v28 = vld [vmem:[#allocation6 + $0x4f0] sm:$0xff]  ;;  %2024 = vmatprep.subr.bf16.mxu1 %v2023_v24  ;;  %v755_v21 = vld [vmem:[#allocation9 + $0x160] sm:$0xff] }
 0x108   :  { %v1901_v34 = vpack.c.bf16 %v304_v28, %v302_v23  ;;  %v324_v24 = vld [vmem:[#allocation6 + $0x590] sm:$0xff]  ;;  %v329_v28 = vld [vmem:[#allocation6 + $0x5b8] sm:$0xff] }
 0x109   :  { %v1921_v30 = vpack.c.bf16 %v324_v24, %v322_v19  ;;  %v350_v19 = vld [vmem:[#allocation6 + $0x660] sm:$0xff] }
 0x10a   :  { %1882 = vmatpush1.bf16.msra.mxu0 %v1881_v38  ;;  %v741_v38 = vld [vmem:[#allocation9 + $0xf0] sm:$0xff]  ;;  %2026 = vmatpush1.bf16.msra.mxu1 %v2025_v33  ;;  %v759_v33 = vld [vmem:[#allocation9 + $0x180] sm:$0xff] }
 0x10b   :  { %1884 = vmatprep.subr.bf16.mxu0 %v1883_v43  ;;  %v311_v43 = vld [vmem:[#allocation6 + $0x528] sm:$0xff]  ;;  %v2029_v45 = vpack.c.bf16 %v741_v38, %v739_v37  ;;  %2028 = vmatprep.subr.bf16.mxu1 %v2027_v36  ;;  %v328_v36 = vld [vmem:[#allocation6 + $0x5b0] sm:$0xff]  ;;  %v766_v38 = vld [vmem:[#allocation9 + $0x1b8] sm:$0xff] }
 0x10c   :  { %v1907_v51 = vpack.c.bf16 %v313_v44, %v311_v43  ;;  %v764_v37 = vld [vmem:[#allocation9 + $0x1a8] sm:$0xff]  ;;  %v1925_v42 = vpack.c.bf16 %v328_v36, %v326_v31  ;;  %v330_v43 = vld [vmem:[#allocation6 + $0x5c0] sm:$0xff] }
 0x10d   :  { %v2051_v44 = vpack.c.bf16 %v766_v38, %v764_v37  ;;  %v358_v31 = vld [vmem:[#allocation6 + $0x6a0] sm:$0xff]  ;;  %v364_v38 = vld [vmem:[#allocation6 + $0x6d0] sm:$0xff] }
 0x10e   :  { %1886 = vmatpush1.bf16.msra.mxu0 %v1885_v50  ;;  %v745_v50 = vld [vmem:[#allocation9 + $0x110] sm:$0xff]  ;;  %2030 = vmatpush1.bf16.msra.mxu1 %v2029_v45  ;;  %v763_v45 = vld [vmem:[#allocation9 + $0x1a0] sm:$0xff] }
 0x10f   :  { %1888 = vmatprep.subr.bf16.mxu0 %v1887_v55  ;;  %v315_v55 = vld [vmem:[#allocation6 + $0x548] sm:$0xff]  ;;  %v2033_v57 = vpack.c.bf16 %v745_v50, %v743_v49  ;;  %2032 = vmatprep.subr.bf16.mxu1 %v2031_v48  ;;  %v332_v48 = vld [vmem:[#allocation6 + $0x5d0] sm:$0xff]  ;;  %v770_v50 = vld [vmem:[#allocation9 + $0x1d8] sm:$0xff] }
 0x110   :  { %v1911_v63 = vpack.c.bf16 %v317_v56, %v315_v55  ;;  %v768_v49 = vld [vmem:[#allocation9 + $0x1c8] sm:$0xff]  ;;  %v1929_v54 = vpack.c.bf16 %v332_v48, %v330_v43  ;;  %v362_v37 = vld [vmem:[#allocation6 + $0x6c0] sm:$0xff] }
 0x111   :  { %v2055_v55 = vpack.c.bf16 %v770_v50, %v768_v49  ;;  %v366_v43 = vld [vmem:[#allocation6 + $0x6e0] sm:$0xff]  ;;  %v372_v50 = vld [vmem:[#allocation6 + $0x710] sm:$0xff] }
 0x112   :  { %1890 = vmatpush1.bf16.msra.mxu0 %v1889_v62  ;;  %v749_v62 = vld [vmem:[#allocation9 + $0x130] sm:$0xff]  ;;  %2034 = vmatpush1.bf16.msra.mxu1 %v2033_v57  ;;  %v334_v57 = vld [vmem:[#allocation6 + $0x5e0] sm:$0xff] }
 0x113   :  { %1892 = vmatprep.subr.bf16.mxu0 %v1891_v3  ;;  %v319_v3 = vld [vmem:[#allocation6 + $0x568] sm:$0xff]  ;;  %v2037_v5 = vpack.c.bf16 %v749_v62, %v747_v61  ;;  %2036 = vmatprep.subr.bf16.mxu1 %v2035_v60  ;;  %v341_v60 = vld [vmem:[#allocation6 + $0x618] sm:$0xff]  ;;  %v370_v49 = vld [vmem:[#allocation6 + $0x700] sm:$0xff] }
 0x114   :  { %v1915_v11 = vpack.c.bf16 %v321_v4, %v319_v3  ;;  %v1935_v62 = vpack.c.bf16 %v341_v60, %v339_v59  ;;  %v142_v3 = vld [vmem:[#allocation3 + $0x20] sm:$0xff] }
 0x116   :  { %1894 = vmatpush1.bf16.msra.mxu0 %v1893_v10  ;;  %v753_v10 = vld [vmem:[#allocation9 + $0x150] sm:$0xff]  ;;  %2038 = vmatpush1.bf16.msra.mxu1 %v2037_v5  ;;  %v1939_v5 = vpack.c.bf16 %v345_v2, %v343_v1 }
 0x117   :  { %1896 = vmatprep.subr.bf16.mxu0 %v1895_v15  ;;  %v323_v15 = vld [vmem:[#allocation6 + $0x588] sm:$0xff]  ;;  %v2041_v17 = vpack.c.bf16 %v753_v10, %v751_v9  ;;  %2040 = vmatprep.subr.bf16.mxu1 %v2039_v8  ;;  %v145_v8 = vld [vmem:[#allocation3 + $0x38] sm:$0xff] }
 0x118   :  { %v1919_v23 = vpack.c.bf16 %v325_v16, %v323_v15  ;;  %v347_v9 = vld [vmem:[#allocation6 + $0x648] sm:$0xff]  ;;  %v349_v10 = vld [vmem:[#allocation6 + $0x658] sm:$0xff] }
 0x119   :  { %v1943_v12 = vpack.c.bf16 %v349_v10, %v347_v9  ;;  %v351_v15 = vld [vmem:[#allocation6 + $0x668] sm:$0xff]  ;;  %v353_v16 = vld [vmem:[#allocation6 + $0x678] sm:$0xff]  ;;  %v386_v9 = vld [vmem:[#allocation6 + $0x780] sm:$0xff] }
 0x11a   :  { %1898 = vmatpush1.bf16.msra.mxu0 %v1897_v22  ;;  %v757_v22 = vld [vmem:[#allocation9 + $0x170] sm:$0xff]  ;;  %2042 = vmatpush1.bf16.msra.mxu1 %v2041_v17  ;;  %v1945_v17 = vpack.c.bf16 %v348_v14, %v346_v13 }
 0x11b   :  { %1900 = vmatprep.subr.bf16.mxu0 %v1899_v27  ;;  %v327_v27 = vld [vmem:[#allocation6 + $0x5a8] sm:$0xff]  ;;  %v2045_v29 = vpack.c.bf16 %v757_v22, %v755_v21  ;;  %2044 = vmatprep.subr.bf16.mxu1 %v2043_v20  ;;  %v352_v20 = vld [vmem:[#allocation6 + $0x670] sm:$0xff]  ;;  %v357_v22 = vld [vmem:[#allocation6 + $0x698] sm:$0xff] }
 0x11c   :  { %v1923_v35 = vpack.c.bf16 %v329_v28, %v327_v27  ;;  %v355_v21 = vld [vmem:[#allocation6 + $0x688] sm:$0xff]  ;;  %v361_v28 = vld [vmem:[#allocation6 + $0x6b8] sm:$0xff]  ;;  %v388_v10 = vld [vmem:[#allocation6 + $0x790] sm:$0xff] }
 0x11d   :  { %v1951_v24 = vpack.c.bf16 %v357_v22, %v355_v21  ;;  %v359_v27 = vld [vmem:[#allocation6 + $0x6a8] sm:$0xff]  ;;  %v1985_v13 = vpack.c.bf16 %v388_v10, %v386_v9  ;;  %v394_v21 = vld [vmem:[#allocation6 + $0x7c0] sm:$0xff]  ;;  %v396_v22 = vld [vmem:[#allocation6 + $0x7d0] sm:$0xff] }
 0x11e   :  { %1902 = vmatpush1.bf16.msra.mxu0 %v1901_v34  ;;  %v761_v34 = vld [vmem:[#allocation9 + $0x190] sm:$0xff]  ;;  %2046 = vmatpush1.bf16.msra.mxu1 %v2045_v29  ;;  %v1953_v29 = vpack.c.bf16 %v356_v26, %v354_v25  ;;  %v1993_v25 = vpack.c.bf16 %v396_v22, %v394_v21 }
 0x11f   :  { %1904 = vmatprep.subr.bf16.mxu0 %v1903_v39  ;;  %v331_v39 = vld [vmem:[#allocation6 + $0x5c8] sm:$0xff]  ;;  %v2049_v41 = vpack.c.bf16 %v761_v34, %v759_v33  ;;  %2048 = vmatprep.subr.bf16.mxu1 %v2047_v32  ;;  %v360_v32 = vld [vmem:[#allocation6 + $0x6b0] sm:$0xff]  ;;  %v365_v34 = vld [vmem:[#allocation6 + $0x6d8] sm:$0xff] }
 0x120   :  { %v1927_v47 = vpack.c.bf16 %v333_v40, %v331_v39  ;;  %v363_v33 = vld [vmem:[#allocation6 + $0x6c8] sm:$0xff]  ;;  %v369_v40 = vld [vmem:[#allocation6 + $0x6f8] sm:$0xff] }
 0x121   :  { %v1959_v36 = vpack.c.bf16 %v365_v34, %v363_v33  ;;  %v367_v39 = vld [vmem:[#allocation6 + $0x6e8] sm:$0xff]  ;;  %v878_v10 = vld [vmem:[#allocation11 + $0x90] sm:$0xff] }
 0x122   :  { %1906 = vmatpush1.bf16.msra.mxu0 %v1905_v46  ;;  %v765_v46 = vld [vmem:[#allocation9 + $0x1b0] sm:$0xff]  ;;  %2050 = vmatpush1.bf16.msra.mxu1 %v2049_v41  ;;  %v1961_v41 = vpack.c.bf16 %v364_v38, %v362_v37  ;;  %v772_v34 = vld [vmem:[#allocation9 + $0x1e8] sm:$0xff]  ;;  %v771_v37 = vld [vmem:[#allocation9 + $0x1e0] sm:$0xff] }
 0x123   :  { %1908 = vmatprep.subr.bf16.mxu0 %v1907_v51  ;;  %v335_v51 = vld [vmem:[#allocation6 + $0x5e8] sm:$0xff]  ;;  %v2053_v53 = vpack.c.bf16 %v765_v46, %v763_v45  ;;  %2052 = vmatprep.subr.bf16.mxu1 %v2051_v44  ;;  %v368_v44 = vld [vmem:[#allocation6 + $0x6f0] sm:$0xff]  ;;  %v373_v46 = vld [vmem:[#allocation6 + $0x718] sm:$0xff] }
 0x124   :  { %v1931_v56 = vpack.c.bf16 %v337_v52, %v335_v51  ;;  %v371_v45 = vld [vmem:[#allocation6 + $0x708] sm:$0xff]  ;;  %v377_v52 = vld [vmem:[#allocation6 + $0x738] sm:$0xff] }
 0x125   :  { %v1967_v48 = vpack.c.bf16 %v373_v46, %v371_v45  ;;  %v375_v51 = vld [vmem:[#allocation6 + $0x728] sm:$0xff]  ;;  %v773_v38 = vld [vmem:[#allocation9 + $0x1f0] sm:$0xff]  ;;  %v695_v46 = vld [vmem:[#allocation8] sm:$0x3] }
 0x126   :  { %1910 = vmatpush1.bf16.msra.mxu0 %v1909_v58  ;;  %v336_v58 = vld [vmem:[#allocation6 + $0x5f0] sm:$0xff]  ;;  %2054 = vmatpush1.bf16.msra.mxu1 %v2053_v53  ;;  %v1969_v53 = vpack.c.bf16 %v372_v50, %v370_v49 }
 0x127   :  { %1912 = vmatprep.subr.bf16.mxu0 %v1911_v63  ;;  %v1933_v61 = vpack.c.bf16 %v336_v58, %v334_v57  ;;  %2056 = vmatprep.subr.bf16.mxu1 %v2055_v55  ;;  %v338_v63 = vld [vmem:[#allocation6 + $0x600] sm:$0xff]  ;;  %v379_v57 = vld [vmem:[#allocation6 + $0x748] sm:$0xff]  ;;  %v381_v58 = vld [vmem:[#allocation6 + $0x758] sm:$0xff] }
 0x128   :  { %v1937_v4 = vpack.c.bf16 %v340_v0, %v338_v63  ;;  %v374_v55 = vld [vmem:[#allocation6 + $0x720] sm:$0xff]  ;;  %v1975_v60 = vpack.c.bf16 %v381_v58, %v379_v57  ;;  %v383_v63 = vld [vmem:[#allocation6 + $0x768] sm:$0xff]  ;;  %v385_v0 = vld [vmem:[#allocation6 + $0x778] sm:$0xff] }
 0x129   :  { %v1979_v2 = vpack.c.bf16 %v385_v0, %v383_v63  ;;  %v870_v57 = vld [vmem:[#allocation11 + $0x50] sm:$0xff]  ;;  %v869_v63 = vld [vmem:[#allocation11 + $0x48] sm:$0xff] }
 0x12a   :  { %1914 = vmatpush1.bf16.msra.mxu0 %v1913_v6  ;;  %v342_v6 = vld [vmem:[#allocation6 + $0x620] sm:$0xff]  ;;  %v873_v0 = vld [vmem:[#allocation11 + $0x68] sm:$0xff]  ;;  %v890_v22 = vld [vmem:[#allocation11 + $0xf0] sm:$0xff] }
 0x12b   :  { %1916 = vmatprep.subr.bf16.mxu0 %v1915_v11  ;;  %v1941_v11 = vpack.c.bf16 %v344_v7, %v342_v6  ;;  %v389_v6 = vld [vmem:[#allocation6 + $0x798] sm:$0xff] }
 0x12e   :  { %1918 = vmatpush1.bf16.msra.mxu0 %v1917_v18  ;;  %v1947_v18 = vpack.c.bf16 %v353_v16, %v351_v15  ;;  %v390_v15 = vld [vmem:[#allocation6 + $0x7a0] sm:$0xff]  ;;  %v392_v16 = vld [vmem:[#allocation6 + $0x7b0] sm:$0xff] }
 0x12f   :  { %1920 = vmatprep.subr.bf16.mxu0 %v1919_v23  ;;  %v1949_v23 = vpack.c.bf16 %v352_v20, %v350_v19  ;;  %v1989_v19 = vpack.c.bf16 %v392_v16, %v390_v15  ;;  %v884_v16 = vld [vmem:[#allocation11 + $0xc0] sm:$0xff] }
 0x132   :  { %1922 = vmatpush1.bf16.msra.mxu0 %v1921_v30  ;;  %v1955_v30 = vpack.c.bf16 %v361_v28, %v359_v27  ;;  %v398_v27 = vld [vmem:[#allocation6 + $0x7e0] sm:$0xff]  ;;  %v400_v28 = vld [vmem:[#allocation6 + $0x7f0] sm:$0xff] }
 0x133   :  { %1924 = vmatprep.subr.bf16.mxu0 %v1923_v35  ;;  %v1957_v35 = vpack.c.bf16 %v360_v32, %v358_v31  ;;  %v767_v31 = vld [vmem:[#allocation9 + $0x1c0] sm:$0xff]  ;;  %v769_v32 = vld [vmem:[#allocation9 + $0x1d0] sm:$0xff] }
 0x134   :  { %v2057_v33 = vpack.c.bf16 %v769_v32, %v767_v31  ;;  %v906_v31 = vld [vmem:[#allocation11 + $0x170] sm:$0xff] }
 0x136   :  { %1926 = vmatpush1.bf16.msra.mxu0 %v1925_v42  ;;  %v1963_v42 = vpack.c.bf16 %v369_v40, %v367_v39  ;;  %2058 = vmatpush1.bf16.msra.mxu1 %v2057_v33  ;;  %v2061_v39 = vpack.c.bf16 %v773_v38, %v771_v37  ;;  %v861_v40 = vld [vmem:[#allocation11 + $0x8] sm:$0xff]  ;;  %v912_v37 = vld [vmem:[#allocation11 + $0x1a0] sm:$0xff] }
 0x137   :  { %1928 = vmatprep.subr.bf16.mxu0 %v1927_v47  ;;  %v1965_v47 = vpack.c.bf16 %v368_v44, %v366_v43  ;;  %v697_v43 = vlaneseq }
 0x139   :  { %v2696_v44 = vshrl.u32 %v697_v43, 7  ;;  %v918_v43 = vld [vmem:[#allocation11 + $0x1d0] sm:$0xff] }
 0x13a   :  { %1930 = vmatpush1.bf16.msra.mxu0 %v1929_v54  ;;  %v1971_v54 = vpack.c.bf16 %v377_v52, %v375_v51 }
 0x13b   :  { %1932 = vmatprep.subr.bf16.mxu0 %v1931_v56  ;;  %v376_v56 = vld [vmem:[#allocation6 + $0x730] sm:$0xff]  ;;  %v2699_v45 = vsub.s32 0, %v2696_v44 }
 0x13c   :  { %v1973_v59 = vpack.c.bf16 %v376_v56, %v374_v55  ;;  %v867_v56 = vld [vmem:[#allocation11 + $0x38] sm:$0xff] }
 0x13e   :  { %1934 = vmatpush1.bf16.msra.mxu0 %v1933_v61  ;;  %v378_v61 = vld [vmem:[#allocation6 + $0x740] sm:$0xff] }
 0x13f   :  { %1936 = vmatprep.subr.bf16.mxu0 %v1935_v62  ;;  %v380_v62 = vld [vmem:[#allocation6 + $0x750] sm:$0xff] }
 0x140   :  { %v1977_v1 = vpack.c.bf16 %v380_v62, %v378_v61  ;;  %v2067_v61 = vpack.c.bf16 %v870_v57, %v867_v56  ;;  %v866_v62 = vld [vmem:[#allocation11 + $0x30] sm:$0xff]  ;;  %v923_v56 = vld [vmem:[#allocation11 + $0x1f8] sm:$0xff] }
 0x141   :  { %609 = vmatmul.mubr.f32.vlgmr.msra.gmra.mrb[0].mxu0 %v142_v3  ;;  %v382_v3 = vld [vmem:[#allocation6 + $0x760] sm:$0xff] }
 0x142   :  { %1938 = vmatpush1.bf16.msra.mxu0 %v1937_v4  ;;  %679 = vmatprep.mubr.f32.mxu0 %v145_v8  ;;  %v384_v4 = vld [vmem:[#allocation6 + $0x770] sm:$0xff]  ;;  %v927_v57 = vld [vmem:[#allocation11 + $0x218] sm:$0xff] }
 0x143   :  { %1940 = vmatprep.subr.bf16.mxu0 %v1939_v5  ;;  %v387_v5 = vld [vmem:[#allocation6 + $0x788] sm:$0xff]  ;;  %v1981_v7 = vpack.c.bf16 %v384_v4, %v382_v3 }
 0x144   :  { %v1983_v8 = vpack.c.bf16 %v389_v6, %v387_v5  ;;  %v872_v4 = vld [vmem:[#allocation11 + $0x60] sm:$0xff]  ;;  %v875_v5 = vld [vmem:[#allocation11 + $0x78] sm:$0xff] }
 0x145   :  { %v879_v6 = vld [vmem:[#allocation11 + $0x98] sm:$0xff] }
 0x146   :  { %1942 = vmatpush1.bf16.msra.mxu0 %v1941_v11  ;;  %v391_v11 = vld [vmem:[#allocation6 + $0x7a8] sm:$0xff] }
 0x147   :  { %1944 = vmatprep.subr.bf16.mxu0 %v1943_v12  ;;  %v393_v12 = vld [vmem:[#allocation6 + $0x7b8] sm:$0xff] }
 0x148   :  { %v1987_v14 = vpack.c.bf16 %v393_v12, %v391_v11  ;;  %v881_v11 = vld [vmem:[#allocation11 + $0xa8] sm:$0xff] }
 0x149   :  { %v885_v12 = vld [vmem:[#allocation11 + $0xc8] sm:$0xff] }
 0x14a   :  { %1946 = vmatpush1.bf16.msra.mxu0 %v1945_v17  ;;  %v395_v17 = vld [vmem:[#allocation6 + $0x7c8] sm:$0xff] }
 0x14b   :  { %1948 = vmatprep.subr.bf16.mxu0 %v1947_v18  ;;  %v397_v18 = vld [vmem:[#allocation6 + $0x7d8] sm:$0xff] }
 0x14c   :  { %v1991_v20 = vpack.c.bf16 %v397_v18, %v395_v17  ;;  %v887_v17 = vld [vmem:[#allocation11 + $0xd8] sm:$0xff] }
 0x14d   :  { %v891_v18 = vld [vmem:[#allocation11 + $0xf8] sm:$0xff] }
 0x14e   :  { %1950 = vmatpush1.bf16.msra.mxu0 %v1949_v23  ;;  %v399_v23 = vld [vmem:[#allocation6 + $0x7e8] sm:$0xff] }
 0x14f   :  { %1952 = vmatprep.subr.bf16.mxu0 %v1951_v24  ;;  %v401_v24 = vld [vmem:[#allocation6 + $0x7f8] sm:$0xff] }
 0x150   :  { %v1995_v26 = vpack.c.bf16 %v401_v24, %v399_v23  ;;  %v893_v23 = vld [vmem:[#allocation11 + $0x108] sm:$0xff] }
 0x151   :  { %v897_v24 = vld [vmem:[#allocation11 + $0x128] sm:$0xff] }
 0x152   :  { %1954 = vmatpush1.bf16.msra.mxu0 %v1953_v29  ;;  %v1997_v29 = vpack.c.bf16 %v400_v28, %v398_v27  ;;  %v896_v28 = vld [vmem:[#allocation11 + $0x120] sm:$0xff] }
 0x153   :  { %1956 = vmatprep.subr.bf16.mxu0 %v1955_v30  ;;  %v144_v30 = vld [vmem:[#allocation3 + $0x30] sm:$0xff] }
 0x156   :  { %1958 = vmatpush1.bf16.msra.mxu0 %v1957_v35  ;;  %v774_v35 = vld [vmem:[#allocation9 + $0x1f8] sm:$0xff] }
 0x157   :  { %1960 = vmatprep.subr.bf16.mxu0 %v1959_v36  ;;  %v2059_v36 = vpack.c.bf16 %v774_v35, %v772_v34  ;;  %v902_v34 = vld [vmem:[#allocation11 + $0x150] sm:$0xff]  ;;  %v905_v35 = vld [vmem:[#allocation11 + $0x168] sm:$0xff] }
 0x158   :  { %v2093_v38 = vpack.c.bf16 %v905_v35, %v902_v34  ;;  %v865_v34 = vld [vmem:[#allocation11 + $0x28] sm:$0xff] }
 0x159   :  { %2060 = vmatprep.subr.bf16.mxu1 %v2059_v36  ;;  %v909_v36 = vld [vmem:[#allocation11 + $0x188] sm:$0xff] }
 0x15a   :  { %1962 = vmatpush1.bf16.msra.mxu0 %v1961_v41  ;;  %2062 = vmatpush1.bf16.msra.mxu1 %v2061_v39  ;;  %v864_v41 = vld [vmem:[#allocation11 + $0x20] sm:$0xff]  ;;  %v2095_v39 = vpack.c.bf16 %v912_v37, %v909_v36  ;;  %v919_v37 = vld [vmem:[#allocation11 + $0x1d8] sm:$0xff] }
 0x15b   :  { %1964 = vmatprep.subr.bf16.mxu0 %v1963_v42  ;;  %v2063_v42 = vpack.c.bf16 %v864_v41, %v861_v40  ;;  %v908_v40 = vld [vmem:[#allocation11 + $0x180] sm:$0xff]  ;;  %v911_v41 = vld [vmem:[#allocation11 + $0x198] sm:$0xff] }
 0x15c   :  { %v916_v36 = vld [vmem:[#allocation11 + $0x1c0] sm:$0xff] }
 0x15d   :  { %2064 = vmatprep.subr.bf16.mxu1 %v2063_v42  ;;  %v915_v42 = vld [vmem:[#allocation11 + $0x1b8] sm:$0xff] }
 0x15e   :  { %1966 = vmatpush1.bf16.msra.mxu0 %v1965_v47  ;;  %v2702_v47 = vsub.s32 1, %v2696_v44 }
 0x15f   :  { %1968 = vmatprep.subr.bf16.mxu0 %v1967_v48  ;;  %v700_v48 = vrot.slane %v695_v46, %v2699_v45 }
 0x160   :  { %v704_v49 = vrot.slane %v695_v46, %v2702_v47  ;;  %v2097_v46 = vpack.c.bf16 %v911_v41, %v908_v40  ;;  %v2131_v41 = vpack.c.bf16 %v919_v37, %v916_v36  ;;  %v1128_v36 = vld [vmem:[#allocation12 + $0x60] sm:$0xff]  ;;  %v1131_v37 = vld [vmem:[#allocation12 + $0x78] sm:$0xff] }
 0x162   :  { %1970 = vmatpush1.bf16.msra.mxu0 %v1969_v53  ;;  %v860_v53 = vld [vmem:[#allocation11] sm:$0xff] }
 0x163   :  { %1972 = vmatprep.subr.bf16.mxu0 %v1971_v54  ;;  %v863_v54 = vld [vmem:[#allocation11 + $0x18] sm:$0xff] }
 0x166   :  { %1974 = vmatpush1.bf16.msra.mxu0 %v1973_v59  ;;  %v2065_v59 = vpack.c.bf16 %v863_v54, %v860_v53 }
 0x167   :  { %1976 = vmatprep.subr.bf16.mxu0 %v1975_v60 }
 0x16a   :  { %1978 = vmatpush1.bf16.msra.mxu0 %v1977_v1  ;;  %v876_v1 = vld [vmem:[#allocation11 + $0x80] sm:$0xff] }
 0x16b   :  { %1980 = vmatprep.subr.bf16.mxu0 %v1979_v2  ;;  %v2069_v2 = vpack.c.bf16 %v869_v63, %v866_v62  ;;  %v2071_v3 = vpack.c.bf16 %v876_v1, %v873_v0  ;;  %v929_v62 = vld [vmem:[#allocation11 + $0x228] sm:$0xff]  ;;  %v936_v0 = vld [vmem:[#allocation11 + $0x260] sm:$0xff] }
 0x16c   :  { %v933_v63 = vld [vmem:[#allocation11 + $0x248] sm:$0xff] }
 0x16e   :  { %1982 = vmatpush1.bf16.msra.mxu0 %v1981_v7  ;;  %v882_v7 = vld [vmem:[#allocation11 + $0xb0] sm:$0xff] }
 0x16f   :  { %1984 = vmatprep.subr.bf16.mxu0 %v1983_v8  ;;  %v2073_v8 = vpack.c.bf16 %v875_v5, %v872_v4  ;;  %v2075_v9 = vpack.c.bf16 %v882_v7, %v879_v6  ;;  %v935_v4 = vld [vmem:[#allocation11 + $0x258] sm:$0xff]  ;;  %v942_v6 = vld [vmem:[#allocation11 + $0x290] sm:$0xff] }
 0x170   :  { %v939_v5 = vld [vmem:[#allocation11 + $0x278] sm:$0xff] }
 0x172   :  { %1986 = vmatpush1.bf16.msra.mxu0 %v1985_v13  ;;  %v888_v13 = vld [vmem:[#allocation11 + $0xe0] sm:$0xff] }
 0x173   :  { %1988 = vmatprep.subr.bf16.mxu0 %v1987_v14  ;;  %v2077_v14 = vpack.c.bf16 %v881_v11, %v878_v10  ;;  %v2079_v15 = vpack.c.bf16 %v888_v13, %v885_v12  ;;  %v941_v10 = vld [vmem:[#allocation11 + $0x288] sm:$0xff]  ;;  %v948_v12 = vld [vmem:[#allocation11 + $0x2c0] sm:$0xff] }
 0x174   :  { %v945_v11 = vld [vmem:[#allocation11 + $0x2a8] sm:$0xff] }
 0x176   :  { %1990 = vmatpush1.bf16.msra.mxu0 %v1989_v19  ;;  %v894_v19 = vld [vmem:[#allocation11 + $0x110] sm:$0xff] }
 0x177   :  { %1992 = vmatprep.subr.bf16.mxu0 %v1991_v20  ;;  %v2081_v20 = vpack.c.bf16 %v887_v17, %v884_v16  ;;  %v2083_v21 = vpack.c.bf16 %v894_v19, %v891_v18  ;;  %v947_v16 = vld [vmem:[#allocation11 + $0x2b8] sm:$0xff]  ;;  %v954_v19 = vld [vmem:[#allocation11 + $0x2f0] sm:$0xff] }
 0x178   :  { %v951_v18 = vld [vmem:[#allocation11 + $0x2d8] sm:$0xff] }
 0x17a   :  { %1994 = vmatpush1.bf16.msra.mxu0 %v1993_v25  ;;  %v900_v25 = vld [vmem:[#allocation11 + $0x140] sm:$0xff] }
 0x17b   :  { %1996 = vmatprep.subr.bf16.mxu0 %v1995_v26  ;;  %v2085_v26 = vpack.c.bf16 %v893_v23, %v890_v22  ;;  %v2087_v27 = vpack.c.bf16 %v900_v25, %v897_v24  ;;  %v953_v22 = vld [vmem:[#allocation11 + $0x2e8] sm:$0xff]  ;;  %v910_v24 = vld [vmem:[#allocation11 + $0x190] sm:$0xff] }
 0x17c   :  { %v913_v25 = vld [vmem:[#allocation11 + $0x1a8] sm:$0xff] }
 0x17e   :  { %1998 = vmatpush1.bf16.msra.mxu0 %v1997_v29  ;;  %v899_v29 = vld [vmem:[#allocation11 + $0x138] sm:$0xff] }
 0x17f   :  { %v2089_v32 = vpack.c.bf16 %v899_v29, %v896_v28 }
 0x181   :  { %680 = vmatmul.mubr.f32.vlgmr.msra.gmra.mrb[0].mxu0 %v144_v30  ;;  %v903_v30 = vld [vmem:[#allocation11 + $0x158] sm:$0xff] }
 0x182   :  { %v2091_v33 = vpack.c.bf16 %v906_v31, %v903_v30 }
 0x254   :  { %v681_v50 = vpop.f32.mrb[0].mxu0 }
 0x255   :  { %v707_v51 = vadd.f32 %v700_v48, %v681_v50  ;;  %v683_v52 = vpop.f32.mrb[1].mxu0  ;;  %v2099_v48 = vpack.c.bf16 %v918_v43, %v915_v42  ;;  %v917_v50 = vld [vmem:[#allocation11 + $0x1c8] sm:$0xff]  ;;  %v868_v42 = vld [vmem:[#allocation11 + $0x40] sm:$0xff]  ;;  %v871_v43 = vld [vmem:[#allocation11 + $0x58] sm:$0xff] }
 0x256   :  { %v708_v55 = vadd.f32 %v704_v49, %v683_v52  ;;  %v914_v49 = vld [vmem:[#allocation11 + $0x1b0] sm:$0xff]  ;;  %v924_v52 = vld [vmem:[#allocation11 + $0x200] sm:$0xff] }
 0x257   :  { %v709_v60 = vmax.f32 %v707_v51, 0.0  ;;  %v921_v51 = vld [vmem:[#allocation11 + $0x1e8] sm:$0xff]  ;;  %v2101_v53 = vpack.c.bf16 %v917_v50, %v914_v49  ;;  %v2133_v49 = vpack.c.bf16 %v871_v43, %v868_v42  ;;  %v1134_v43 = vld [vmem:[#allocation12 + $0x90] sm:$0xff] }
 0x258   :  { %v710_v58 = vmax.f32 %v708_v55, 0.0  ;;  %v2103_v54 = vpack.c.bf16 %v924_v52, %v921_v51  ;;  %v920_v55 = vld [vmem:[#allocation11 + $0x1e0] sm:$0xff]  ;;  %v874_v51 = vld [vmem:[#allocation11 + $0x70] sm:$0xff]  ;;  %v877_v52 = vld [vmem:[#allocation11 + $0x88] sm:$0xff] }
 0x25a   :  { %851 = vmatprep.mubr.f32.mxu1 %v710_v58  ;;  %v930_v58 = vld [vmem:[#allocation11 + $0x230] sm:$0xff] }
 0x25b   :  { %852 = vmatmul.mubr.f32.vlgmr.msra.gmra.mrb[0].mxu1 %v709_v60  ;;  %v2107_v60 = vpack.c.bf16 %v930_v58, %v927_v57  ;;  %v880_v57 = vld [vmem:[#allocation11 + $0xa0] sm:$0xff]  ;;  %v883_v58 = vld [vmem:[#allocation11 + $0xb8] sm:$0xff] }
 0x25c   :  { %2066 = vmatpush1.bf16.msra.mxu1 %v2065_v59  ;;  %v2105_v59 = vpack.c.bf16 %v923_v56, %v920_v55  ;;  %v2137_v55 = vpack.c.bf16 %v877_v52, %v874_v51  ;;  %v1143_v51 = vld [vmem:[#allocation12 + $0xd8] sm:$0xff] }
 0x25d   :  { %2068 = vmatprep.subr.bf16.mxu1 %v2067_v61  ;;  %v926_v61 = vld [vmem:[#allocation11 + $0x210] sm:$0xff]  ;;  %v1147_v52 = vld [vmem:[#allocation12 + $0xf8] sm:$0xff] }
 0x25e   :  { %v2109_v1 = vpack.c.bf16 %v929_v62, %v926_v61  ;;  %v2141_v61 = vpack.c.bf16 %v883_v58, %v880_v57  ;;  %v1149_v57 = vld [vmem:[#allocation12 + $0x108] sm:$0xff] }
 0x25f   :  { %v1153_v58 = vld [vmem:[#allocation12 + $0x128] sm:$0xff] }
 0x260   :  { %2070 = vmatpush1.bf16.msra.mxu1 %v2069_v2  ;;  %v2111_v2 = vpack.c.bf16 %v936_v0, %v933_v63  ;;  %v886_v63 = vld [vmem:[#allocation11 + $0xd0] sm:$0xff]  ;;  %v889_v0 = vld [vmem:[#allocation11 + $0xe8] sm:$0xff] }
 0x261   :  { %2072 = vmatprep.subr.bf16.mxu1 %v2071_v3  ;;  %v932_v3 = vld [vmem:[#allocation11 + $0x240] sm:$0xff] }
 0x262   :  { %v2113_v7 = vpack.c.bf16 %v935_v4, %v932_v3  ;;  %v2145_v3 = vpack.c.bf16 %v889_v0, %v886_v63  ;;  %v1155_v63 = vld [vmem:[#allocation12 + $0x138] sm:$0xff] }
 0x263   :  { %v1159_v0 = vld [vmem:[#allocation12 + $0x158] sm:$0xff] }
 0x264   :  { %2074 = vmatpush1.bf16.msra.mxu1 %v2073_v8  ;;  %v2115_v8 = vpack.c.bf16 %v942_v6, %v939_v5  ;;  %v892_v5 = vld [vmem:[#allocation11 + $0x100] sm:$0xff]  ;;  %v895_v6 = vld [vmem:[#allocation11 + $0x118] sm:$0xff] }
 0x265   :  { %2076 = vmatprep.subr.bf16.mxu1 %v2075_v9  ;;  %v938_v9 = vld [vmem:[#allocation11 + $0x270] sm:$0xff] }
 0x266   :  { %v2117_v13 = vpack.c.bf16 %v941_v10, %v938_v9  ;;  %v2149_v9 = vpack.c.bf16 %v895_v6, %v892_v5  ;;  %v1161_v5 = vld [vmem:[#allocation12 + $0x168] sm:$0xff] }
 0x267   :  { %v1165_v6 = vld [vmem:[#allocation12 + $0x188] sm:$0xff] }
 0x268   :  { %2078 = vmatpush1.bf16.msra.mxu1 %v2077_v14  ;;  %v2119_v14 = vpack.c.bf16 %v948_v12, %v945_v11  ;;  %v898_v11 = vld [vmem:[#allocation11 + $0x130] sm:$0xff]  ;;  %v901_v12 = vld [vmem:[#allocation11 + $0x148] sm:$0xff] }
 0x269   :  { %2080 = vmatprep.subr.bf16.mxu1 %v2079_v15  ;;  %v944_v15 = vld [vmem:[#allocation11 + $0x2a0] sm:$0xff] }
 0x26a   :  { %v2121_v17 = vpack.c.bf16 %v947_v16, %v944_v15  ;;  %v2153_v15 = vpack.c.bf16 %v901_v12, %v898_v11  ;;  %v1167_v11 = vld [vmem:[#allocation12 + $0x198] sm:$0xff] }
 0x26b   :  { %v1171_v12 = vld [vmem:[#allocation12 + $0x1b8] sm:$0xff] }
 0x26c   :  { %2082 = vmatpush1.bf16.msra.mxu1 %v2081_v20  ;;  %v2123_v20 = vpack.c.bf16 %v954_v19, %v951_v18  ;;  %v907_v18 = vld [vmem:[#allocation11 + $0x178] sm:$0xff]  ;;  %v1117_v19 = vld [vmem:[#allocation12 + $0x8] sm:$0xff] }
 0x26d   :  { %2084 = vmatprep.subr.bf16.mxu1 %v2083_v21  ;;  %v950_v21 = vld [vmem:[#allocation11 + $0x2d0] sm:$0xff] }
 0x26e   :  { %v2125_v23 = vpack.c.bf16 %v953_v22, %v950_v21 }
 0x270   :  { %2086 = vmatpush1.bf16.msra.mxu1 %v2085_v26  ;;  %v2127_v26 = vpack.c.bf16 %v913_v25, %v910_v24  ;;  %v1119_v24 = vld [vmem:[#allocation12 + $0x18] sm:$0xff] }
 0x271   :  { %2088 = vmatprep.subr.bf16.mxu1 %v2087_v27  ;;  %v775_v27 = vld [vmem:[%s2759_s4] sm:$0x3] }
 0x272   :  { %v780_v28 = vrot.slane %v775_v27, %v2699_v45  ;;  %v784_v29 = vrot.slane %v775_v27, %v2702_v47  ;;  %v1123_v25 = vld [vmem:[#allocation12 + $0x38] sm:$0xff] }
 0x274   :  { %2090 = vmatpush1.bf16.msra.mxu1 %v2089_v32 }
 0x275   :  { %2092 = vmatprep.subr.bf16.mxu1 %v2091_v33  ;;  %v862_v33 = vld [vmem:[#allocation11 + $0x10] sm:$0xff] }
 0x278   :  { %2094 = vmatpush1.bf16.msra.mxu1 %v2093_v38 }
 0x279   :  { %2096 = vmatprep.subr.bf16.mxu1 %v2095_v39  ;;  %v2129_v39 = vpack.c.bf16 %v865_v34, %v862_v33  ;;  %v1132_v33 = vld [vmem:[#allocation12 + $0x80] sm:$0xff] }
 0x27c   :  { %2098 = vmatpush1.bf16.msra.mxu1 %v2097_v46  ;;  %v922_v46 = vld [vmem:[#allocation11 + $0x1f0] sm:$0xff] }
 0x27d   :  { %2100 = vmatprep.subr.bf16.mxu1 %v2099_v48  ;;  %v925_v48 = vld [vmem:[#allocation11 + $0x208] sm:$0xff] }
 0x27e   :  { %v2135_v50 = vpack.c.bf16 %v925_v48, %v922_v46  ;;  %v1137_v46 = vld [vmem:[#allocation12 + $0xa8] sm:$0xff] }
 0x27f   :  { %v1141_v48 = vld [vmem:[#allocation12 + $0xc8] sm:$0xff] }
 0x280   :  { %2102 = vmatpush1.bf16.msra.mxu1 %v2101_v53  ;;  %v928_v53 = vld [vmem:[#allocation11 + $0x220] sm:$0xff] }
 0x281   :  { %2104 = vmatprep.subr.bf16.mxu1 %v2103_v54  ;;  %v931_v54 = vld [vmem:[#allocation11 + $0x238] sm:$0xff] }
 0x282   :  { %v2139_v56 = vpack.c.bf16 %v931_v54, %v928_v53  ;;  %v1150_v53 = vld [vmem:[#allocation12 + $0x110] sm:$0xff] }
 0x284   :  { %2106 = vmatpush1.bf16.msra.mxu1 %v2105_v59  ;;  %v934_v59 = vld [vmem:[#allocation11 + $0x250] sm:$0xff] }
 0x285   :  { %2108 = vmatprep.subr.bf16.mxu1 %v2107_v60  ;;  %v937_v60 = vld [vmem:[#allocation11 + $0x268] sm:$0xff] }
 0x286   :  { %v2143_v62 = vpack.c.bf16 %v937_v60, %v934_v59  ;;  %v1156_v59 = vld [vmem:[#allocation12 + $0x140] sm:$0xff] }
 0x288   :  { %2110 = vmatpush1.bf16.msra.mxu1 %v2109_v1  ;;  %v940_v1 = vld [vmem:[#allocation11 + $0x280] sm:$0xff] }
 0x289   :  { %2112 = vmatprep.subr.bf16.mxu1 %v2111_v2  ;;  %v943_v2 = vld [vmem:[#allocation11 + $0x298] sm:$0xff] }
 0x28a   :  { %v2147_v4 = vpack.c.bf16 %v943_v2, %v940_v1  ;;  %v1162_v1 = vld [vmem:[#allocation12 + $0x170] sm:$0xff] }
 0x28c   :  { %2114 = vmatpush1.bf16.msra.mxu1 %v2113_v7  ;;  %v946_v7 = vld [vmem:[#allocation11 + $0x2b0] sm:$0xff] }
 0x28d   :  { %2116 = vmatprep.subr.bf16.mxu1 %v2115_v8  ;;  %v949_v8 = vld [vmem:[#allocation11 + $0x2c8] sm:$0xff] }
 0x28e   :  { %v2151_v10 = vpack.c.bf16 %v949_v8, %v946_v7  ;;  %v1168_v7 = vld [vmem:[#allocation12 + $0x1a0] sm:$0xff] }
 0x290   :  { %2118 = vmatpush1.bf16.msra.mxu1 %v2117_v13  ;;  %v952_v13 = vld [vmem:[#allocation11 + $0x2e0] sm:$0xff] }
 0x291   :  { %2120 = vmatprep.subr.bf16.mxu1 %v2119_v14  ;;  %v955_v14 = vld [vmem:[#allocation11 + $0x2f8] sm:$0xff] }
 0x292   :  { %v2155_v16 = vpack.c.bf16 %v955_v14, %v952_v13  ;;  %v1174_v13 = vld [vmem:[#allocation12 + $0x1d0] sm:$0xff] }
 0x294   :  { %2122 = vmatpush1.bf16.msra.mxu1 %v2121_v17  ;;  %v904_v17 = vld [vmem:[#allocation11 + $0x160] sm:$0xff] }
 0x295   :  { %2124 = vmatprep.subr.bf16.mxu1 %v2123_v20  ;;  %v1120_v20 = vld [vmem:[#allocation12 + $0x20] sm:$0xff]  ;;  %v2157_v21 = vpack.c.bf16 %v907_v18, %v904_v17  ;;  %v1173_v17 = vld [vmem:[#allocation12 + $0x1c8] sm:$0xff] }
 0x296   :  { %v2159_v22 = vpack.c.bf16 %v1120_v20, %v1117_v19  ;;  %v1177_v18 = vld [vmem:[#allocation12 + $0x1e8] sm:$0xff]  ;;  %v1180_v19 = vld [vmem:[#allocation12 + $0x200] sm:$0xff] }
 0x298   :  { %2126 = vmatpush1.bf16.msra.mxu1 %v2125_v23  ;;  %v1116_v23 = vld [vmem:[#allocation12] sm:$0xff] }
 0x299   :  { %2128 = vmatprep.subr.bf16.mxu1 %v2127_v26  ;;  %v1126_v26 = vld [vmem:[#allocation12 + $0x50] sm:$0xff]  ;;  %v2161_v27 = vpack.c.bf16 %v1119_v24, %v1116_v23  ;;  %v1179_v23 = vld [vmem:[#allocation12 + $0x1f8] sm:$0xff] }
 0x29a   :  { %v1183_v24 = vld [vmem:[#allocation12 + $0x218] sm:$0xff] }
 0x32e   :  { %v853_v30 = vpop.f32.mrb[0].mxu1 }
 0x32f   :  { %v2711_v31 = vadd.f32 %v853_v30, %v780_v28  ;;  %v855_v32 = vpop.f32.mrb[1].mxu1  ;;  %v2163_v28 = vpack.c.bf16 %v1126_v26, %v1123_v25  ;;  %v1125_v30 = vld [vmem:[#allocation12 + $0x48] sm:$0xff]  ;;  %v1186_v25 = vld [vmem:[#allocation12 + $0x230] sm:$0xff] }
 0x330   :  { %v856_v35 = vadd.f32 %v855_v32, %v784_v29  ;;  %v1122_v29 = vld [vmem:[#allocation12 + $0x30] sm:$0xff]  ;;  %v1129_v32 = vld [vmem:[#allocation12 + $0x68] sm:$0xff] }
 0x331   :  { %v858_v40 = vmax.f32 %v2711_v31, 0.0  ;;  %v2165_v34 = vpack.c.bf16 %v1125_v30, %v1122_v29  ;;  %v1185_v29 = vld [vmem:[#allocation12 + $0x228] sm:$0xff] }
 0x332   :  { %v859_v38 = vmax.f32 %v856_v35, 0.0  ;;  %v2167_v35 = vpack.c.bf16 %v1132_v33, %v1129_v32  ;;  %v1189_v30 = vld [vmem:[#allocation12 + $0x248] sm:$0xff]  ;;  %v1192_v32 = vld [vmem:[#allocation12 + $0x260] sm:$0xff] }
 0x334   :  { %1037 = vmatprep.mubr.f32.mxu1 %v859_v38 }
 0x335   :  { %1038 = vmatmul.mubr.f32.vlgmr.msra.gmra.mrb[2].mxu1 %v858_v40 }
 0x336   :  { %2130 = vmatpush3.bf16.msra.mxu1 %v2129_v39  ;;  %1108 = vmatprep.mubr.f32.mxu1 %v859_v38  ;;  %v1135_v38 = vld [vmem:[#allocation12 + $0x98] sm:$0xff]  ;;  %v1138_v39 = vld [vmem:[#allocation12 + $0xb0] sm:$0xff] }
 0x337   :  { %2132 = vmatprep.subr.bf16.mxu1 %v2131_v41  ;;  %v2169_v41 = vpack.c.bf16 %v1131_v37, %v1128_v36  ;;  %v2171_v42 = vpack.c.bf16 %v1138_v39, %v1135_v38  ;;  %v1191_v36 = vld [vmem:[#allocation12 + $0x258] sm:$0xff]  ;;  %v1198_v38 = vld [vmem:[#allocation12 + $0x290] sm:$0xff] }
 0x338   :  { %v1195_v37 = vld [vmem:[#allocation12 + $0x278] sm:$0xff] }
 0x33a   :  { %2134 = vmatpush3.bf16.msra.mxu1 %v2133_v49  ;;  %v1144_v49 = vld [vmem:[#allocation12 + $0xe0] sm:$0xff] }
 0x33b   :  { %2136 = vmatprep.subr.bf16.mxu1 %v2135_v50  ;;  %v2173_v50 = vpack.c.bf16 %v1137_v46, %v1134_v43  ;;  %v2175_v31 = vpack.c.bf16 %v1144_v49, %v1141_v48  ;;  %v1197_v43 = vld [vmem:[#allocation12 + $0x288] sm:$0xff]  ;;  %v1204_v48 = vld [vmem:[#allocation12 + $0x2c0] sm:$0xff] }
 0x33c   :  { %v1201_v46 = vld [vmem:[#allocation12 + $0x2a8] sm:$0xff] }
 0x33e   :  { %2138 = vmatpush3.bf16.msra.mxu1 %v2137_v55  ;;  %v2179_v55 = vpack.c.bf16 %v1150_v53, %v1147_v52  ;;  %v1210_v52 = vld [vmem:[#allocation12 + $0x2f0] sm:$0xff] }
 0x33f   :  { %2140 = vmatprep.subr.bf16.mxu1 %v2139_v56  ;;  %v1146_v56 = vld [vmem:[#allocation12 + $0xf0] sm:$0xff] }
 0x340   :  { %v2181_v60 = vpack.c.bf16 %v1149_v57, %v1146_v56  ;;  %v1209_v56 = vld [vmem:[#allocation12 + $0x2e8] sm:$0xff]  ;;  %v1166_v57 = vld [vmem:[#allocation12 + $0x190] sm:$0xff] }
 0x342   :  { %2142 = vmatpush3.bf16.msra.mxu1 %v2141_v61  ;;  %v2183_v61 = vpack.c.bf16 %v1156_v59, %v1153_v58  ;;  %v1169_v58 = vld [vmem:[#allocation12 + $0x1a8] sm:$0xff] }
 0x343   :  { %2144 = vmatprep.subr.bf16.mxu1 %v2143_v62  ;;  %v1152_v62 = vld [vmem:[#allocation12 + $0x120] sm:$0xff] }
 0x344   :  { %v2185_v2 = vpack.c.bf16 %v1155_v63, %v1152_v62  ;;  %v1389_v62 = vld [vmem:[#allocation14 + $0x88] sm:$0xff]  ;;  %v1372_v63 = vld [vmem:[#allocation14] sm:$0xff] }
 0x346   :  { %2146 = vmatpush3.bf16.msra.mxu1 %v2145_v3  ;;  %v2187_v3 = vpack.c.bf16 %v1162_v1, %v1159_v0  ;;  %v1373_v1 = vld [vmem:[#allocation14 + $0x8] sm:$0xff] }
 0x347   :  { %2148 = vmatprep.subr.bf16.mxu1 %v2147_v4  ;;  %v1158_v4 = vld [vmem:[#allocation12 + $0x150] sm:$0xff] }
 0x348   :  { %v2189_v8 = vpack.c.bf16 %v1161_v5, %v1158_v4  ;;  %v2257_v4 = vpack.c.bf16 %v1373_v1, %v1372_v63  ;;  %v1187_v63 = vld [vmem:[#allocation12 + $0x238] sm:$0xff] }
 0x34a   :  { %2150 = vmatpush3.bf16.msra.mxu1 %v2149_v9  ;;  %v2191_v9 = vpack.c.bf16 %v1168_v7, %v1165_v6  ;;  %v1374_v6 = vld [vmem:[#allocation14 + $0x10] sm:$0xff]  ;;  %v1375_v7 = vld [vmem:[#allocation14 + $0x18] sm:$0xff] }
 0x34b   :  { %2152 = vmatprep.subr.bf16.mxu1 %v2151_v10  ;;  %v1164_v10 = vld [vmem:[#allocation12 + $0x180] sm:$0xff] }
 0x34c   :  { %v2193_v14 = vpack.c.bf16 %v1167_v11, %v1164_v10  ;;  %v2261_v10 = vpack.c.bf16 %v1375_v7, %v1374_v6 }
 0x34e   :  { %2154 = vmatpush3.bf16.msra.mxu1 %v2153_v15  ;;  %v2195_v15 = vpack.c.bf16 %v1174_v13, %v1171_v12  ;;  %v1376_v12 = vld [vmem:[#allocation14 + $0x20] sm:$0xff]  ;;  %v1377_v13 = vld [vmem:[#allocation14 + $0x28] sm:$0xff] }
 0x34f   :  { %2156 = vmatprep.subr.bf16.mxu1 %v2155_v16  ;;  %v1170_v16 = vld [vmem:[#allocation12 + $0x1b0] sm:$0xff] }
 0x350   :  { %v2197_v20 = vpack.c.bf16 %v1173_v17, %v1170_v16  ;;  %v2265_v16 = vpack.c.bf16 %v1377_v13, %v1376_v12 }
 0x352   :  { %2158 = vmatpush3.bf16.msra.mxu1 %v2157_v21  ;;  %v2199_v21 = vpack.c.bf16 %v1180_v19, %v1177_v18  ;;  %v1378_v18 = vld [vmem:[#allocation14 + $0x30] sm:$0xff]  ;;  %v1379_v19 = vld [vmem:[#allocation14 + $0x38] sm:$0xff] }
 0x353   :  { %2160 = vmatprep.subr.bf16.mxu1 %v2159_v22  ;;  %v1176_v22 = vld [vmem:[#allocation12 + $0x1e0] sm:$0xff] }
 0x354   :  { %v2201_v26 = vpack.c.bf16 %v1179_v23, %v1176_v22  ;;  %v2269_v22 = vpack.c.bf16 %v1379_v19, %v1378_v18 }
 0x355   :  { %1109 = vmatmul.mubr.f32.vlgmr.msra.gmra.mrb[4].mxu1 %v858_v40  ;;  %v1140_v40 = vld [vmem:[#allocation12 + $0xc0] sm:$0xff] }
 0x356   :  { %2162 = vmatpush1.bf16.msra.mxu1 %v2161_v27  ;;  %v2177_v54 = vpack.c.bf16 %v1143_v51, %v1140_v40  ;;  %v2203_v27 = vpack.c.bf16 %v1186_v25, %v1183_v24  ;;  %v1203_v40 = vld [vmem:[#allocation12 + $0x2b8] sm:$0xff]  ;;  %v1380_v24 = vld [vmem:[#allocation14 + $0x40] sm:$0xff]  ;;  %v1381_v25 = vld [vmem:[#allocation14 + $0x48] sm:$0xff] }
 0x357   :  { %2164 = vmatprep.subr.bf16.mxu1 %v2163_v28  ;;  %v1182_v28 = vld [vmem:[#allocation12 + $0x210] sm:$0xff]  ;;  %v1207_v51 = vld [vmem:[#allocation12 + $0x2d8] sm:$0xff] }
 0x358   :  { %v2205_v33 = vpack.c.bf16 %v1185_v29, %v1182_v28  ;;  %v2273_v28 = vpack.c.bf16 %v1381_v25, %v1380_v24 }
 0x35a   :  { %2166 = vmatpush1.bf16.msra.mxu1 %v2165_v34  ;;  %v2207_v34 = vpack.c.bf16 %v1192_v32, %v1189_v30  ;;  %v1382_v30 = vld [vmem:[#allocation14 + $0x50] sm:$0xff]  ;;  %v1383_v32 = vld [vmem:[#allocation14 + $0x58] sm:$0xff] }
 0x35b   :  { %2168 = vmatprep.subr.bf16.mxu1 %v2167_v35  ;;  %v1188_v35 = vld [vmem:[#allocation12 + $0x240] sm:$0xff] }
 0x35c   :  { %v2209_v39 = vpack.c.bf16 %v1191_v36, %v1188_v35  ;;  %v2277_v35 = vpack.c.bf16 %v1383_v32, %v1382_v30 }
 0x35e   :  { %2170 = vmatpush1.bf16.msra.mxu1 %v2169_v41  ;;  %v2211_v41 = vpack.c.bf16 %v1198_v38, %v1195_v37  ;;  %v2721_v37 = vld [vmem:[%s2761_s6] sm:$0x7] }
 0x35f   :  { %2172 = vmatprep.subr.bf16.mxu1 %v2171_v42  ;;  %v1194_v42 = vld [vmem:[#allocation12 + $0x270] sm:$0xff]  ;;  %v961_v38 = vrot.slane %v2721_v37, %v2699_v45 }
 0x360   :  { %v2213_v49 = vpack.c.bf16 %v1197_v43, %v1194_v42 }
 0x362   :  { %2174 = vmatpush1.bf16.msra.mxu1 %v2173_v50  ;;  %v2215_v50 = vpack.c.bf16 %v1204_v48, %v1201_v46  ;;  %v1118_v46 = vld [vmem:[#allocation12 + $0x10] sm:$0xff]  ;;  %v1121_v48 = vld [vmem:[#allocation12 + $0x28] sm:$0xff] }
 0x363   :  { %2176 = vmatprep.subr.bf16.mxu1 %v2175_v31  ;;  %v1200_v31 = vld [vmem:[#allocation12 + $0x2a0] sm:$0xff] }
 0x364   :  { %v2217_v53 = vpack.c.bf16 %v1203_v40, %v1200_v31  ;;  %v1175_v31 = vld [vmem:[#allocation12 + $0x1d8] sm:$0xff] }
 0x366   :  { %2178 = vmatpush1.bf16.msra.mxu1 %v2177_v54  ;;  %v2219_v54 = vpack.c.bf16 %v1210_v52, %v1207_v51  ;;  %v2225_v51 = vpack.c.bf16 %v1121_v48, %v1118_v46  ;;  %v1420_v46 = vld [vmem:[#allocation14 + $0x180] sm:$0xff]  ;;  %v1421_v48 = vld [vmem:[#allocation14 + $0x188] sm:$0xff] }
 0x367   :  { %2180 = vmatprep.subr.bf16.mxu1 %v2179_v55  ;;  %v1206_v55 = vld [vmem:[#allocation12 + $0x2d0] sm:$0xff] }
 0x368   :  { %v2221_v59 = vpack.c.bf16 %v1209_v56, %v1206_v55  ;;  %v1127_v55 = vld [vmem:[#allocation12 + $0x58] sm:$0xff]  ;;  %v1178_v56 = vld [vmem:[#allocation12 + $0x1f0] sm:$0xff] }
 0x36a   :  { %2182 = vmatpush1.bf16.msra.mxu1 %v2181_v60  ;;  %v2223_v60 = vpack.c.bf16 %v1169_v58, %v1166_v57  ;;  %v1181_v57 = vld [vmem:[#allocation12 + $0x208] sm:$0xff] }
 0x36b   :  { %2184 = vmatprep.subr.bf16.mxu1 %v2183_v61  ;;  %v1388_v61 = vld [vmem:[#allocation14 + $0x80] sm:$0xff] }
 0x36c   :  { %v2255_v0 = vpack.c.bf16 %v1389_v62, %v1388_v61  ;;  %v1133_v61 = vld [vmem:[#allocation12 + $0x88] sm:$0xff]  ;;  %v1184_v62 = vld [vmem:[#allocation12 + $0x220] sm:$0xff] }
 0x36d   :  { %v2235_v1 = vpack.c.bf16 %v1187_v63, %v1184_v62  ;;  %v1426_v62 = vld [vmem:[#allocation14 + $0x1b0] sm:$0xff]  ;;  %v1427_v63 = vld [vmem:[#allocation14 + $0x1b8] sm:$0xff] }
 0x36e   :  { %2186 = vmatpush1.bf16.msra.mxu1 %v2185_v2  ;;  %v1390_v2 = vld [vmem:[#allocation14 + $0x90] sm:$0xff]  ;;  %2256 = vmatprep.subr.bf16.mxu0 %v2255_v0 }
 0x36f   :  { %2188 = vmatprep.subr.bf16.mxu1 %v2187_v3  ;;  %v1391_v3 = vld [vmem:[#allocation14 + $0x98] sm:$0xff]  ;;  %2258 = vmatpush3.bf16.msra.mxu0 %v2257_v4  ;;  %v1190_v4 = vld [vmem:[#allocation12 + $0x250] sm:$0xff] }
 0x370   :  { %v2259_v5 = vpack.c.bf16 %v1391_v3, %v1390_v2  ;;  %v1136_v2 = vld [vmem:[#allocation12 + $0xa0] sm:$0xff]  ;;  %v1139_v3 = vld [vmem:[#allocation12 + $0xb8] sm:$0xff] }
 0x371   :  { %v2237_v6 = vpack.c.bf16 %v1139_v3, %v1136_v2  ;;  %v1410_v2 = vld [vmem:[#allocation14 + $0x130] sm:$0xff]  ;;  %v1411_v3 = vld [vmem:[#allocation14 + $0x138] sm:$0xff] }
 0x372   :  { %2190 = vmatpush1.bf16.msra.mxu1 %v2189_v8  ;;  %v1392_v8 = vld [vmem:[#allocation14 + $0xa0] sm:$0xff]  ;;  %2260 = vmatprep.subr.bf16.mxu0 %v2259_v5  ;;  %v1193_v5 = vld [vmem:[#allocation12 + $0x268] sm:$0xff] }
 0x373   :  { %2192 = vmatprep.subr.bf16.mxu1 %v2191_v9  ;;  %v1393_v9 = vld [vmem:[#allocation14 + $0xa8] sm:$0xff]  ;;  %2262 = vmatpush3.bf16.msra.mxu0 %v2261_v10  ;;  %v2239_v7 = vpack.c.bf16 %v1193_v5, %v1190_v4  ;;  %v1196_v10 = vld [vmem:[#allocation12 + $0x280] sm:$0xff] }
 0x374   :  { %v2263_v11 = vpack.c.bf16 %v1393_v9, %v1392_v8  ;;  %v1142_v8 = vld [vmem:[#allocation12 + $0xd0] sm:$0xff]  ;;  %v1145_v9 = vld [vmem:[#allocation12 + $0xe8] sm:$0xff]  ;;  %v1428_v4 = vld [vmem:[#allocation14 + $0x1c0] sm:$0xff] }
 0x375   :  { %v2241_v12 = vpack.c.bf16 %v1145_v9, %v1142_v8  ;;  %v1429_v5 = vld [vmem:[#allocation14 + $0x1c8] sm:$0xff]  ;;  %v1412_v8 = vld [vmem:[#allocation14 + $0x140] sm:$0xff] }
 0x376   :  { %2194 = vmatpush1.bf16.msra.mxu1 %v2193_v14  ;;  %v1394_v14 = vld [vmem:[#allocation14 + $0xb0] sm:$0xff]  ;;  %2264 = vmatprep.subr.bf16.mxu0 %v2263_v11  ;;  %v1199_v11 = vld [vmem:[#allocation12 + $0x298] sm:$0xff]  ;;  %v1413_v9 = vld [vmem:[#allocation14 + $0x148] sm:$0xff] }
 0x377   :  { %2196 = vmatprep.subr.bf16.mxu1 %v2195_v15  ;;  %v1395_v15 = vld [vmem:[#allocation14 + $0xb8] sm:$0xff]  ;;  %2266 = vmatpush3.bf16.msra.mxu0 %v2265_v16  ;;  %v2243_v13 = vpack.c.bf16 %v1199_v11, %v1196_v10  ;;  %v1202_v16 = vld [vmem:[#allocation12 + $0x2b0] sm:$0xff] }
 0x378   :  { %v2267_v17 = vpack.c.bf16 %v1395_v15, %v1394_v14  ;;  %v1148_v14 = vld [vmem:[#allocation12 + $0x100] sm:$0xff]  ;;  %v1151_v15 = vld [vmem:[#allocation12 + $0x118] sm:$0xff]  ;;  %v1430_v10 = vld [vmem:[#allocation14 + $0x1d0] sm:$0xff] }
 0x379   :  { %v2245_v18 = vpack.c.bf16 %v1151_v15, %v1148_v14  ;;  %v1431_v11 = vld [vmem:[#allocation14 + $0x1d8] sm:$0xff]  ;;  %v1414_v14 = vld [vmem:[#allocation14 + $0x150] sm:$0xff] }
 0x37a   :  { %2198 = vmatpush1.bf16.msra.mxu1 %v2197_v20  ;;  %v1396_v20 = vld [vmem:[#allocation14 + $0xc0] sm:$0xff]  ;;  %2268 = vmatprep.subr.bf16.mxu0 %v2267_v17  ;;  %v1205_v17 = vld [vmem:[#allocation12 + $0x2c8] sm:$0xff]  ;;  %v1415_v15 = vld [vmem:[#allocation14 + $0x158] sm:$0xff] }
 0x37b   :  { %2200 = vmatprep.subr.bf16.mxu1 %v2199_v21  ;;  %v1397_v21 = vld [vmem:[#allocation14 + $0xc8] sm:$0xff]  ;;  %2270 = vmatpush3.bf16.msra.mxu0 %v2269_v22  ;;  %v2247_v19 = vpack.c.bf16 %v1205_v17, %v1202_v16  ;;  %v1208_v22 = vld [vmem:[#allocation12 + $0x2e0] sm:$0xff] }
 0x37c   :  { %v2271_v23 = vpack.c.bf16 %v1397_v21, %v1396_v20  ;;  %v1154_v20 = vld [vmem:[#allocation12 + $0x130] sm:$0xff]  ;;  %v1157_v21 = vld [vmem:[#allocation12 + $0x148] sm:$0xff]  ;;  %v1432_v16 = vld [vmem:[#allocation14 + $0x1e0] sm:$0xff] }
 0x37d   :  { %v2249_v24 = vpack.c.bf16 %v1157_v21, %v1154_v20  ;;  %v1433_v17 = vld [vmem:[#allocation14 + $0x1e8] sm:$0xff]  ;;  %v1416_v20 = vld [vmem:[#allocation14 + $0x160] sm:$0xff] }
 0x37e   :  { %2202 = vmatpush1.bf16.msra.mxu1 %v2201_v26  ;;  %v1398_v26 = vld [vmem:[#allocation14 + $0xd0] sm:$0xff]  ;;  %2272 = vmatprep.subr.bf16.mxu0 %v2271_v23  ;;  %v1211_v23 = vld [vmem:[#allocation12 + $0x2f8] sm:$0xff]  ;;  %v1417_v21 = vld [vmem:[#allocation14 + $0x168] sm:$0xff] }
 0x37f   :  { %2204 = vmatprep.subr.bf16.mxu1 %v2203_v27  ;;  %v1399_v27 = vld [vmem:[#allocation14 + $0xd8] sm:$0xff]  ;;  %2274 = vmatpush3.bf16.msra.mxu0 %v2273_v28  ;;  %v2251_v25 = vpack.c.bf16 %v1211_v23, %v1208_v22  ;;  %v2313_v22 = vpack.c.bf16 %v1417_v21, %v1416_v20  ;;  %v1434_v23 = vld [vmem:[#allocation14 + $0x1f0] sm:$0xff] }
 0x380   :  { %v2275_v29 = vpack.c.bf16 %v1399_v27, %v1398_v26  ;;  %v1160_v26 = vld [vmem:[#allocation12 + $0x160] sm:$0xff]  ;;  %v1163_v27 = vld [vmem:[#allocation12 + $0x178] sm:$0xff] }
 0x382   :  { %2206 = vmatpush1.bf16.msra.mxu1 %v2205_v33  ;;  %v1400_v33 = vld [vmem:[#allocation14 + $0xe0] sm:$0xff]  ;;  %2276 = vmatprep.subr.bf16.mxu0 %v2275_v29  ;;  %v2253_v29 = vpack.c.bf16 %v1163_v27, %v1160_v26  ;;  %v1418_v26 = vld [vmem:[#allocation14 + $0x170] sm:$0xff]  ;;  %v1419_v27 = vld [vmem:[#allocation14 + $0x178] sm:$0xff] }
 0x383   :  { %2208 = vmatprep.subr.bf16.mxu1 %v2207_v34  ;;  %v1401_v34 = vld [vmem:[#allocation14 + $0xe8] sm:$0xff]  ;;  %2278 = vmatpush3.bf16.msra.mxu0 %v2277_v35 }
 0x384   :  { %v2279_v36 = vpack.c.bf16 %v1401_v34, %v1400_v33  ;;  %v1384_v33 = vld [vmem:[#allocation14 + $0x60] sm:$0xff]  ;;  %v1385_v34 = vld [vmem:[#allocation14 + $0x68] sm:$0xff] }
 0x385   :  { %v2281_v35 = vpack.c.bf16 %v1385_v34, %v1384_v33 }
 0x386   :  { %2210 = vmatpush1.bf16.msra.mxu1 %v2209_v39  ;;  %2280 = vmatprep.subr.bf16.mxu0 %v2279_v36  ;;  %v965_v39 = vrot.slane %v2721_v37, %v2702_v47  ;;  %v1402_v36 = vld [vmem:[#allocation14 + $0xf0] sm:$0xff] }
 0x387   :  { %2212 = vmatprep.subr.bf16.mxu1 %v2211_v41  ;;  %2282 = vmatpush3.bf16.msra.mxu0 %v2281_v35 }
 0x38a   :  { %2214 = vmatpush1.bf16.msra.mxu1 %v2213_v49 }
 0x38b   :  { %2216 = vmatprep.subr.bf16.mxu1 %v2215_v50  ;;  %v1172_v50 = vld [vmem:[#allocation12 + $0x1c0] sm:$0xff] }
 0x38e   :  { %2218 = vmatpush1.bf16.msra.mxu1 %v2217_v53  ;;  %v2227_v53 = vpack.c.bf16 %v1175_v31, %v1172_v50  ;;  %v1404_v50 = vld [vmem:[#allocation14 + $0x100] sm:$0xff]  ;;  %v1405_v31 = vld [vmem:[#allocation14 + $0x108] sm:$0xff] }
 0x38f   :  { %2220 = vmatprep.subr.bf16.mxu1 %v2219_v54  ;;  %v1124_v54 = vld [vmem:[#allocation12 + $0x40] sm:$0xff] }
 0x390   :  { %v2229_v58 = vpack.c.bf16 %v1127_v55, %v1124_v54  ;;  %v1407_v55 = vld [vmem:[#allocation14 + $0x118] sm:$0xff] }
 0x392   :  { %2222 = vmatpush1.bf16.msra.mxu1 %v2221_v59  ;;  %v2231_v59 = vpack.c.bf16 %v1181_v57, %v1178_v56  ;;  %v1424_v56 = vld [vmem:[#allocation14 + $0x1a0] sm:$0xff]  ;;  %v1425_v57 = vld [vmem:[#allocation14 + $0x1a8] sm:$0xff] }
 0x393   :  { %2224 = vmatprep.subr.bf16.mxu1 %v2223_v60  ;;  %v1130_v60 = vld [vmem:[#allocation12 + $0x70] sm:$0xff] }
 0x394   :  { %v2233_v0 = vpack.c.bf16 %v1133_v61, %v1130_v60  ;;  %v1408_v60 = vld [vmem:[#allocation14 + $0x120] sm:$0xff]  ;;  %v1409_v61 = vld [vmem:[#allocation14 + $0x128] sm:$0xff] }
 0x408   :  { %v1039_v41 = vpop.f32.mrb[2].mxu1 }
 0x409   :  { %v2727_v42 = vadd.f32 %v1039_v41, %v961_v38  ;;  %v1041_v43 = vpop.f32.mrb[3].mxu1  ;;  %v1403_v38 = vld [vmem:[#allocation14 + $0xf8] sm:$0xff]  ;;  %v1386_v41 = vld [vmem:[#allocation14 + $0x70] sm:$0xff] }
 0x40a   :  { %v1042_v49 = vadd.f32 %v1041_v43, %v965_v39  ;;  %v2283_v39 = vpack.c.bf16 %v1403_v38, %v1402_v36 }
 0x40b   :  { %v1114_v52 = vmax.f32 %v2727_v42, 0.0  ;;  %v1387_v42 = vld [vmem:[#allocation14 + $0x78] sm:$0xff] }
 0x40c   :  { %v1115_v40 = vmax.f32 %v1042_v49, 0.0  ;;  %v2285_v43 = vpack.c.bf16 %v1387_v42, %v1386_v41  ;;  %2284 = vmatprep.subr.bf16.mxu0 %v2283_v39  ;;  %v2287_v49 = vpack.c.bf16 %v1421_v48, %v1420_v46  ;;  %v968_v42 = vsub.s32 2, %v2696_v44 }
 0x40e   :  { %1293 = vmatprep.mubr.f32.mxu1 %v1115_v40  ;;  %2286 = vmatpush3.bf16.msra.mxu0 %v2285_v43  ;;  %v969_v48 = vrot.slane %v2721_v37, %v968_v42 }
 0x40f   :  { %1294 = vmatmul.mubr.f32.vlgmr.msra.gmra.mrb[6].mxu1 %v1114_v52 }
 0x410   :  { %2226 = vmatpush3.bf16.msra.mxu1 %v2225_v51  ;;  %1364 = vmatprep.mubr.f32.mxu1 %v1115_v40  ;;  %v2289_v40 = vpack.c.bf16 %v1405_v31, %v1404_v50  ;;  %v1422_v51 = vld [vmem:[#allocation14 + $0x190] sm:$0xff] }
 0x411   :  { %2228 = vmatprep.subr.bf16.mxu1 %v2227_v53  ;;  %v1406_v53 = vld [vmem:[#allocation14 + $0x110] sm:$0xff] }
 0x414   :  { %2230 = vmatpush3.bf16.msra.mxu1 %v2229_v58  ;;  %v2293_v58 = vpack.c.bf16 %v1407_v55, %v1406_v53 }
 0x415   :  { %2232 = vmatprep.subr.bf16.mxu1 %v2231_v59  ;;  %v2295_v59 = vpack.c.bf16 %v1425_v57, %v1424_v56 }
 0x418   :  { %2234 = vmatpush3.bf16.msra.mxu1 %v2233_v0  ;;  %v2297_v0 = vpack.c.bf16 %v1409_v61, %v1408_v60 }
 0x419   :  { %2236 = vmatprep.subr.bf16.mxu1 %v2235_v1  ;;  %v2299_v1 = vpack.c.bf16 %v1427_v63, %v1426_v62 }
 0x41c   :  { %2238 = vmatpush3.bf16.msra.mxu1 %v2237_v6  ;;  %v2301_v6 = vpack.c.bf16 %v1411_v3, %v1410_v2 }
 0x41d   :  { %2240 = vmatprep.subr.bf16.mxu1 %v2239_v7  ;;  %v2303_v7 = vpack.c.bf16 %v1429_v5, %v1428_v4 }
 0x420   :  { %2242 = vmatpush3.bf16.msra.mxu1 %v2241_v12  ;;  %v2305_v12 = vpack.c.bf16 %v1413_v9, %v1412_v8 }
 0x421   :  { %2244 = vmatprep.subr.bf16.mxu1 %v2243_v13  ;;  %v2307_v13 = vpack.c.bf16 %v1431_v11, %v1430_v10 }
 0x424   :  { %2246 = vmatpush3.bf16.msra.mxu1 %v2245_v18  ;;  %v2309_v18 = vpack.c.bf16 %v1415_v15, %v1414_v14 }
 0x425   :  { %2248 = vmatprep.subr.bf16.mxu1 %v2247_v19  ;;  %v2311_v19 = vpack.c.bf16 %v1433_v17, %v1432_v16 }
 0x428   :  { %v1635_v28 = vpop.f32.mrb[4].mxu1  ;;  %2250 = vmatpush3.bf16.msra.mxu1 %v2249_v24  ;;  %v1435_v24 = vld [vmem:[#allocation14 + $0x1f8] sm:$0xff] }
 0x429   :  { %v1636_v30 = vpop.f32.mrb[5].mxu1  ;;  %2252 = vmatprep.subr.bf16.mxu1 %v2251_v25  ;;  %v2315_v25 = vpack.c.bf16 %v1435_v24, %v1434_v23 }
 0x42a   :  { %v2730_v32 = vadd.f32 %v1636_v30, %v1635_v28  ;;  %v2317_v28 = vpack.c.bf16 %v1419_v27, %v1418_v26 }
 0x42c   :  { %2254 = vmatpush3.bf16.msra.mxu1 %v2253_v29  ;;  %v1212_v29 = vld [vmem:[%s2763_s8] sm:$0x7] }
 0x42d   :  { %2288 = vmatprep.subr.bf16.mxu1 %v2287_v49  ;;  %v1217_v30 = vrot.slane %v1212_v29, %v2699_v45  ;;  %v1221_v33 = vrot.slane %v1212_v29, %v2702_v47  ;;  %v1225_v46 = vrot.slane %v1212_v29, %v968_v42  ;;  %v1111_v45 = vadd.f32 %v2730_v32, %v969_v48 }
 0x42f   :  { %1365 = vmatmul.mubr.f32.vlgmr.msra.gmra.mrb[8].mxu1 %v1114_v52  ;;  %v1423_v52 = vld [vmem:[#allocation14 + $0x198] sm:$0xff] }
 0x430   :  { %2290 = vmatpush3.bf16.msra.mxu1 %v2289_v40  ;;  %v2291_v54 = vpack.c.bf16 %v1423_v52, %v1422_v51  ;;  %v1602_v52 = vld [vmem:[%s2765_s10] ss:$0 sm:$0xff] }
 0x432   :  { %2292 = vmatprep.subr.bf16.mxu1 %v2291_v54 }
 0x434   :  { %2294 = vmatpush3.bf16.msra.mxu1 %v2293_v58 }
 0x435   :  { %2296 = vmatprep.subr.bf16.mxu1 %v2295_v59 }
 0x438   :  { %2298 = vmatpush3.bf16.msra.mxu1 %v2297_v0 }
 0x439   :  { %2300 = vmatprep.subr.bf16.mxu1 %v2299_v1 }
 0x43c   :  { %2302 = vmatpush3.bf16.msra.mxu1 %v2301_v6 }
 0x43d   :  { %2304 = vmatprep.subr.bf16.mxu1 %v2303_v7 }
 0x440   :  { %2306 = vmatpush3.bf16.msra.mxu1 %v2305_v12 }
 0x441   :  { %2308 = vmatprep.subr.bf16.mxu1 %v2307_v13 }
 0x444   :  { %2310 = vmatpush3.bf16.msra.mxu1 %v2309_v18 }
 0x445   :  { %2312 = vmatprep.subr.bf16.mxu1 %v2311_v19 }
 0x448   :  { %2314 = vmatpush3.bf16.msra.mxu1 %v2313_v22 }
 0x449   :  { %2316 = vmatprep.subr.bf16.mxu1 %v2315_v25 }
 0x44c   :  { %2318 = vmatpush3.bf16.msra.mxu1 %v2317_v28 }
 0x4e2   :  { %v1295_v34 = vpop.f32.mrb[6].mxu1 }
 0x4e3   :  { %v1296_v35 = vadd.f32 %v1295_v34, %v1217_v30  ;;  %v1297_v36 = vpop.f32.mrb[7].mxu1 }
 0x4e4   :  { %v1298_v38 = vadd.f32 %v1297_v36, %v1221_v33 }
 0x4e5   :  { %v1370_v41 = vmax.f32 %v1296_v35, 0.0 }
 0x4e6   :  { %v1371_v39 = vmax.f32 %v1298_v38, 0.0 }
 0x4e8   :  { %1507 = vmatprep.mubr.f32.mxu0 %v1371_v39 }
 0x4e9   :  { %1508 = vmatmul.mubr.f32.vlgmr.msra.gmra.mrb[2].mxu0 %v1370_v41 }
 0x502   :  { %v1670_v43 = vpop.f32.mrb[8].mxu1 }
 0x503   :  { %v1671_v49 = vpop.f32.mrb[9].mxu1 }
 0x504   :  { %v1672_v50 = vadd.f32 %v1671_v49, %v1670_v43 }
 0x506   :  { %v1367_v31 = vadd.f32 %v1672_v50, %v1225_v46 }
 0x508   :  { %1577 = vmatprep.mubr.f32.mxu1 %v1367_v31 }
 0x509   :  { %1578 = vmatmul.mubr.f32.vlgmr.msra.gmra.mrb[10].mxu1 %v1111_v45 }
 0x5bc   :  { %v1705_v47 = vpop.f32.mrb[2].mxu0 }
 0x5bd   :  { %v1706_v40 = vpop.f32.mrb[3].mxu0 }
 0x5be   :  { %v1707_v51 = vadd.f32 %v1706_v40, %v1705_v47 }
 0x5c0   :  { %v1510_v54 = vadd.f32 %v1707_v51, %v1602_v52 }
 0x5dc   :  { %v1740_v53 = vpop.f32.mrb[10].mxu1 }
 0x5dd   :  { %v1741_v44 = vpop.f32.mrb[11].mxu1 }
 0x5de   :  { %v1742_v37 = vadd.f32 %v1741_v44, %v1740_v53 }
 0x5e0   :  { %v1580_v55 = vadd.f32 %v1742_v37, %v1510_v54 }
 0x5e2   :  { %1583 = vst [vmem:[#allocation15] sm:$0xff] %v1580_v55 }
 0x5e3   :  { %2504 = shalt.err (!%p2501_p4)
}
 0x5e4   :  { %s2505_s10 = scalar_lea.hbm %s2766_s11, 128 }
 0x5e5   :  { %p2506_p5 = scmp.ne.s32.totalorder %s2766_s11, %s2505_s10  ;;  %p2509_p6 = scmp.lt.u32.totalorder %s2505_s10, %s2766_s11 }
 0x5e7   :  { %p2511_p7 = pnand %p2509_p6, %p2506_p5 }
 0x5e9   :  { %2514 = shalt.err (!%p2511_p7)
}
 0x5ea   :  { %1593 = dma.vmem_to_hbm [thread:$0]  %s1591_s29, 128, %s2766_s11, [#allocation5]  }
 0x5eb   :  { %2523 = dma.done.wait [#allocation5], 128  }
 0x5ec   :  { %2524 = vsyncadd [#allocation5], 4294967168 }
 0x5ed   :  { %1597 = vsyncpa [#allocation4], 1 }
 0x5ee   :  { %1598 = vsyncpa [#allocation7], 1 }
 0x5ef   :  { %1599 = vsyncpa [#allocation10], 1 }
 0x5f0   :  { %1600 = vsyncpa [#allocation13], 1 }
 0x5f1   :  { %1601 = vsyncpa [#allocation5], 1 }

</bundles_post_ra>
